<compile_context>
chip_gen: v7x
topology: tpu7x:2x2x1
jax: 0.10.0
libtpu: 0.0.40
codegen_flags: <defaults>
</compile_context>

<pallas_src>
import functools

import jax
import jax.numpy as jnp
from jax.experimental import pallas as pl
from jax.experimental.pallas import tpu as pltpu

# Model dimensions fixed by the PyTorch module.
IN_DIM = 784        # fc1 in / fc4 out
HID_DIM = 400       # fc1 out / fc3 out
LAT_DIM = 20        # fc21 / fc22 out, fc3 in
HEAD_PAD = 128      # logvar head starts at lane 128 (vreg-aligned slice)
HEAD_DIM = 2 * HEAD_PAD  # fused, lane-padded (mu | logvar) projection width


def vae_fwd_kernel(x_ref, eps_ref,
                   w1_ref, b1_ref,
                   wml_ref, bml_ref,
                   w3_ref, b3_ref,
                   w4_ref, b4_ref,
                   recon_ref, mu_ref, logvar_ref):
    """One batch tile of VAE.forward (all intermediates stay in VMEM).

      encode:        h1 = relu(x @ W1 + b1)
                     [mu | logvar] = h1 @ W_ml + b_ml     (fused fc21/fc22)
      reparametrize: z = eps * exp(0.5 * logvar) + mu
      decode:        h3 = relu(z @ W3 + b3)
                     recon = sigmoid(h3 @ W4 + b4)
    """
    f32 = jnp.float32
    bf16 = jnp.bfloat16

    # encode: bf16 MXU operands, f32 accumulate, f32 ReLU on the VPU.
    h1 = jnp.maximum(
        jnp.dot(x_ref[...], w1_ref[...], preferred_element_type=f32)
        + b1_ref[...], 0.0)

    # Fused mu/logvar projection.  logvar columns live at lane offset 128,
    # so both slices below are vreg-aligned (no XLU lane rotate).
    ml = jnp.dot(h1.astype(bf16), wml_ref[...],
                 preferred_element_type=f32) + bml_ref[...]
    mu = ml[:, :LAT_DIM]
    logvar = ml[:, HEAD_PAD:HEAD_PAD + LAT_DIM]

    # Reparametrization trick in f32 (exp goes to the EUP slot; v5e has no
    # bf16 VPU/EUP path, so keep this f32).
    z = eps_ref[...] * jnp.exp(0.5 * logvar) + mu

    # decode
    h3 = jnp.maximum(
        jnp.dot(z.astype(bf16), w3_ref[...], preferred_element_type=f32)
        + b3_ref[...], 0.0)
    recon = jax.nn.sigmoid(
        jnp.dot(h3.astype(bf16), w4_ref[...], preferred_element_type=f32)
        + b4_ref[...])

    recon_ref[...] = recon.astype(recon_ref.dtype)      # bf16 output stream
    mu_ref[...] = mu.astype(mu_ref.dtype)                # f32 (feeds KL)
    logvar_ref[...] = logvar.astype(logvar_ref.dtype)    # f32 (feeds KL)


def _choose_block_b(B, block_b, *, min_steps=4, row_align=16):
    """Core-aware batch tile: largest tile <= block_b that still gives
    ~min_steps grid steps (>= 2 per v7x TensorCore), rows aligned to 16
    (bf16 sublane packing)."""
    bb = -(-B // min_steps)                  # ceil(B / min_steps)
    bb = -(-bb // row_align) * row_align     # round up to row_align
    return max(row_align, min(block_b, bb))


@functools.partial(jax.jit, static_argnames=("block_b",))
def vae_forward(x, eps, w1, b1, w21, b21, w22, b22, w3, b3, w4, b4,
                *, block_b=512):
    """Returns (recon, mu, logvar), matching VAE.forward semantics.

    All weights are pre-transposed to (fan_in, fan_out).  eps is supplied by
    the caller (equivalent of torch.randn in reparametrize) so the kernel is
    deterministic and testable.
    # TODO(synk): in-kernel sampling via pltpu.prng_* could replace the eps
    # input; kept host-provided for determinism / parity with the reference.
    """
    x = x.reshape(-1, IN_DIM)                  # x.view(-1, 784)
    B = x.shape[0]
    bb = _choose_block_b(B, block_b)
    grid_b = pl.cdiv(B, bb)
    B_pad = grid_b * bb
    if B_pad != B:                             # pad instead of asserting B % bb == 0
        x = jnp.pad(x, ((0, B_pad - B), (0, 0)))
        eps = jnp.pad(eps, ((0, B_pad - B), (0, 0)))

    bf16, f32 = jnp.bfloat16, jnp.float32
    x = x.astype(bf16)                         # halves the x HBM stream
    eps = eps.astype(f32)

    # Fuse + lane-pad the mu/logvar heads: mu -> lanes [0, 20),
    # logvar -> lanes [128, 148); the rest is zero.
    wml = jnp.zeros((HID_DIM, HEAD_DIM), bf16)
    wml = wml.at[:, :LAT_DIM].set(w21.astype(bf16))
    wml = wml.at[:, HEAD_PAD:HEAD_PAD + LAT_DIM].set(w22.astype(bf16))
    bml = jnp.zeros((1, HEAD_DIM), f32)
    bml = bml.at[:, :LAT_DIM].set(b21.astype(f32))
    bml = bml.at[:, HEAD_PAD:HEAD_PAD + LAT_DIM].set(b22.astype(f32))

    # bf16 weights for the MXU; biases stay f32 (added to the f32 accumulator).
    w1, w3, w4 = w1.astype(bf16), w3.astype(bf16), w4.astype(bf16)
    b1, b3, b4 = b1.astype(f32), b3.astype(f32), b4.astype(f32)

    row = lambda i: (i, 0)                     # batch-tiled operands
    full = lambda i: (0, 0)                    # weights/biases resident in VMEM
    # VMEM at bb=512: bf16 weights ~1.3 MiB (x2 buffers), x/recon tiles
    # ~0.8 MiB each (x2), f32 intermediates ~2.5 MiB -> well under the
    # default scoped VMEM limit on all generations; no vmem_limit override.

    recon, mu, logvar = pl.pallas_call(
        vae_fwd_kernel,
        out_shape=(
            jax.ShapeDtypeStruct((B_pad, IN_DIM), bf16),    # recon (bf16)
            jax.ShapeDtypeStruct((B_pad, LAT_DIM), f32),    # mu
            jax.ShapeDtypeStruct((B_pad, LAT_DIM), f32),    # logvar
        ),
        grid_spec=pltpu.PrefetchScalarGridSpec(
            num_scalar_prefetch=0,
            grid=(grid_b,),
            in_specs=[
                pl.BlockSpec((bb, IN_DIM), row),             # x tile (bf16)
                pl.BlockSpec((bb, LAT_DIM), row),            # eps tile (f32)
                pl.BlockSpec((IN_DIM, HID_DIM), full),       # W1
                pl.BlockSpec((1, HID_DIM), full),            # b1
                pl.BlockSpec((HID_DIM, HEAD_DIM), full),     # W_ml (fc21|fc22, padded)
                pl.BlockSpec((1, HEAD_DIM), full),           # b_ml
                pl.BlockSpec((LAT_DIM, HID_DIM), full),      # W3
                pl.BlockSpec((1, HID_DIM), full),            # b3
                pl.BlockSpec((HID_DIM, IN_DIM), full),       # W4
                pl.BlockSpec((1, IN_DIM), full),             # b4
            ],
            out_specs=[
                pl.BlockSpec((bb, IN_DIM), row),             # recon
                pl.BlockSpec((bb, LAT_DIM), row),            # mu
                pl.BlockSpec((bb, LAT_DIM), row),            # logvar
            ],
        ),
        compiler_params=pltpu.CompilerParams(
            dimension_semantics=("parallel",)),
    )(x, eps, w1, b1, wml, bml, w3, b3, w4, b4)

    return recon[:B], mu[:B], logvar[:B]


def reference(x, eps, w1, b1, w21, b21, w22, b22, w3, b3, w4, b4):
    """Pure-JAX reference with the same bf16-MXU / f32-accumulate semantics."""
    bf16, f32 = jnp.bfloat16, jnp.float32
    mm = lambda a, b: jnp.dot(a.astype(bf16), b.astype(bf16),
                              preferred_element_type=f32)
    x = x.reshape(-1, IN_DIM)
    h1 = jnp.maximum(mm(x, w1) + b1, 0.0)
    mu = mm(h1, w21) + b21
    logvar = mm(h1, w22) + b22
    z = eps * jnp.exp(0.5 * logvar) + mu
    h3 = jnp.maximum(mm(z, w3) + b3, 0.0)
    recon = jax.nn.sigmoid(mm(h3, w4) + b4)
    return recon, mu, logvar


if __name__ == "__main__":
    B = 40  # non-multiple of the chosen tile -> exercises the padding path
    key = jax.random.PRNGKey(0)
    kx, keps, k1w, k1b, k21w, k21b, k22w, k22b, k3w, k3b, k4w, k4b = (
        jax.random.split(key, 12))

    # MNIST-like input; flattened to (B, 784) inside the wrapper.
    x = jax.random.uniform(kx, (B, 1, 28, 28), jnp.float32)
    # eps drawn on the host (equivalent of torch.randn in reparametrize).
    eps = jax.random.normal(keps, (B, LAT_DIM), jnp.float32)

    def linear_params(kw, kb, fan_in, fan_out):
        # Matches nn.Linear's U(-1/sqrt(fan_in), 1/sqrt(fan_in)) init range,
        # already transposed to (fan_in, fan_out).
        bound = 1.0 / float(fan_in) ** 0.5
        w = jax.random.uniform(kw, (fan_in, fan_out), jnp.float32, -bound, bound)
        b = jax.random.uniform(kb, (1, fan_out), jnp.float32, -bound, bound)
        return w, b

    w1, b1 = linear_params(k1w, k1b, IN_DIM, HID_DIM)
    w21, b21 = linear_params(k21w, k21b, HID_DIM, LAT_DIM)
    w22, b22 = linear_params(k22w, k22b, HID_DIM, LAT_DIM)
    w3, b3 = linear_params(k3w, k3b, LAT_DIM, HID_DIM)
    w4, b4 = linear_params(k4w, k4b, HID_DIM, IN_DIM)

    recon, mu, logvar = vae_forward(
        x, eps, w1, b1, w21, b21, w22, b22, w3, b3, w4, b4)
    recon, mu, logvar = jax.block_until_ready((recon, mu, logvar))

    r_want, mu_want, lv_want = reference(
        x, eps, w1, b1, w21, b21, w22, b22, w3, b3, w4, b4)

    assert recon.shape == (B, IN_DIM) and recon.dtype == jnp.bfloat16
    assert mu.shape == (B, LAT_DIM) and logvar.shape == (B, LAT_DIM)
    assert jnp.allclose(recon.astype(jnp.float32), r_want,
                        atol=2e-2, rtol=2e-2), "recon mismatch"
    assert jnp.allclose(mu, mu_want, atol=1e-2, rtol=1e-2), "mu mismatch"
    assert jnp.allclose(logvar, lv_want, atol=1e-2, rtol=1e-2), "logvar mismatch"

    print("KERNEL_OK")
</pallas_src>

<mosaic_0001>
module attributes {stable_mosaic.version = 11 : i64} {
  func.func @vae_fwd_kernel(%arg0: i32, %arg1: memref<16x784xbf16, #tpu.memory_space<vmem>>, %arg2: memref<16x20xf32, #tpu.memory_space<vmem>>, %arg3: memref<784x400xbf16, #tpu.memory_space<vmem>>, %arg4: memref<1x400xf32, #tpu.memory_space<vmem>>, %arg5: memref<400x256xbf16, #tpu.memory_space<vmem>>, %arg6: memref<1x256xf32, #tpu.memory_space<vmem>>, %arg7: memref<20x400xbf16, #tpu.memory_space<vmem>>, %arg8: memref<1x400xf32, #tpu.memory_space<vmem>>, %arg9: memref<400x784xbf16, #tpu.memory_space<vmem>>, %arg10: memref<1x784xf32, #tpu.memory_space<vmem>>, %arg11: memref<16x784xbf16, #tpu.memory_space<vmem>>, %arg12: memref<16x20xf32, #tpu.memory_space<vmem>>, %arg13: memref<16x20xf32, #tpu.memory_space<vmem>>) attributes {dimension_semantics = [#tpu.dimension_semantics<parallel>], iteration_bounds = array<i64: 3>, scalar_prefetch = 0 : i64, scratch_operands = 0 : i64, tpu.core_type = #tpu.core_type<tc>, window_params = [{transform_indices = @transform_0, window_bounds = array<i64: 16, 784>}, {transform_indices = @transform_1, window_bounds = array<i64: 16, 20>}, {pipeline_mode = #tpu.pipeline_mode<synchronous>, transform_indices = @transform_2, window_bounds = array<i64: 784, 400>}, {pipeline_mode = #tpu.pipeline_mode<synchronous>, transform_indices = @transform_3, window_bounds = array<i64: 1, 400>}, {pipeline_mode = #tpu.pipeline_mode<synchronous>, transform_indices = @transform_4, window_bounds = array<i64: 400, 256>}, {pipeline_mode = #tpu.pipeline_mode<synchronous>, transform_indices = @transform_5, window_bounds = array<i64: 1, 256>}, {pipeline_mode = #tpu.pipeline_mode<synchronous>, transform_indices = @transform_6, window_bounds = array<i64: 20, 400>}, {pipeline_mode = #tpu.pipeline_mode<synchronous>, transform_indices = @transform_7, window_bounds = array<i64: 1, 400>}, {pipeline_mode = #tpu.pipeline_mode<synchronous>, transform_indices = @transform_8, window_bounds = array<i64: 400, 784>}, {pipeline_mode = #tpu.pipeline_mode<synchronous>, transform_indices = @transform_9, window_bounds = array<i64: 1, 784>}, {transform_indices = @transform_10, window_bounds = array<i64: 16, 784>}, {transform_indices = @transform_11, window_bounds = array<i64: 16, 20>}, {transform_indices = @transform_12, window_bounds = array<i64: 16, 20>}]} {
    %c0 = arith.constant 0 : index
    %c0_0 = arith.constant 0 : index
    %0 = vector.load %arg1[%c0, %c0_0] : memref<16x784xbf16, #tpu.memory_space<vmem>>, vector<16x784xbf16>
    %c0_1 = arith.constant 0 : index
    %c0_2 = arith.constant 0 : index
    %1 = vector.load %arg3[%c0_1, %c0_2] : memref<784x400xbf16, #tpu.memory_space<vmem>>, vector<784x400xbf16>
    %cst = arith.constant dense<0.000000e+00> : vector<16x400xf32>
    %2 = tpu.matmul %0, %1, %cst {dimension_numbers = #tpu.dot_dimension_numbers<[1], [0], [0], [1], [0, 0, 1, 1], [], []>} : vector<16x784xbf16>, vector<784x400xbf16>, vector<16x400xf32> -> vector<16x400xf32>
    %c0_3 = arith.constant 0 : index
    %c0_4 = arith.constant 0 : index
    %3 = vector.load %arg4[%c0_3, %c0_4] : memref<1x400xf32, #tpu.memory_space<vmem>>, vector<1x400xf32>
    %4 = vector.broadcast %3 : vector<1x400xf32> to vector<16x400xf32>
    %5 = arith.addf %2, %4 : vector<16x400xf32>
    %cst_5 = arith.constant 0.000000e+00 : f32
    %6 = vector.broadcast %cst_5 : f32 to vector<16x400xf32>
    %7 = arith.maximumf %5, %6 : vector<16x400xf32>
    %8 = arith.truncf %7 : vector<16x400xf32> to vector<16x400xbf16>
    %c0_6 = arith.constant 0 : index
    %c0_7 = arith.constant 0 : index
    %9 = vector.load %arg5[%c0_6, %c0_7] : memref<400x256xbf16, #tpu.memory_space<vmem>>, vector<400x256xbf16>
    %cst_8 = arith.constant dense<0.000000e+00> : vector<16x256xf32>
    %10 = tpu.matmul %8, %9, %cst_8 {dimension_numbers = #tpu.dot_dimension_numbers<[1], [0], [0], [1], [0, 0, 1, 1], [], []>} : vector<16x400xbf16>, vector<400x256xbf16>, vector<16x256xf32> -> vector<16x256xf32>
    %c0_9 = arith.constant 0 : index
    %c0_10 = arith.constant 0 : index
    %11 = vector.load %arg6[%c0_9, %c0_10] : memref<1x256xf32, #tpu.memory_space<vmem>>, vector<1x256xf32>
    %12 = vector.broadcast %11 : vector<1x256xf32> to vector<16x256xf32>
    %13 = arith.addf %10, %12 : vector<16x256xf32>
    %14 = vector.extract_strided_slice %13 {offsets = [0, 0], sizes = [16, 20], strides = [1, 1]} : vector<16x256xf32> to vector<16x20xf32>
    %15 = vector.extract_strided_slice %13 {offsets = [0, 128], sizes = [16, 20], strides = [1, 1]} : vector<16x256xf32> to vector<16x20xf32>
    %c0_11 = arith.constant 0 : index
    %c0_12 = arith.constant 0 : index
    %16 = vector.load %arg2[%c0_11, %c0_12] : memref<16x20xf32, #tpu.memory_space<vmem>>, vector<16x20xf32>
    %cst_13 = arith.constant 5.000000e-01 : f32
    %17 = vector.broadcast %cst_13 : f32 to vector<16x20xf32>
    %18 = arith.mulf %17, %15 : vector<16x20xf32>
    %19 = math.exp %18 : vector<16x20xf32>
    %20 = arith.mulf %16, %19 : vector<16x20xf32>
    %21 = arith.addf %20, %14 : vector<16x20xf32>
    %22 = arith.truncf %21 : vector<16x20xf32> to vector<16x20xbf16>
    %c0_14 = arith.constant 0 : index
    %c0_15 = arith.constant 0 : index
    %23 = vector.load %arg7[%c0_14, %c0_15] : memref<20x400xbf16, #tpu.memory_space<vmem>>, vector<20x400xbf16>
    %cst_16 = arith.constant dense<0.000000e+00> : vector<16x400xf32>
    %24 = tpu.matmul %22, %23, %cst_16 {dimension_numbers = #tpu.dot_dimension_numbers<[1], [0], [0], [1], [0, 0, 1, 1], [], []>} : vector<16x20xbf16>, vector<20x400xbf16>, vector<16x400xf32> -> vector<16x400xf32>
    %c0_17 = arith.constant 0 : index
    %c0_18 = arith.constant 0 : index
    %25 = vector.load %arg8[%c0_17, %c0_18] : memref<1x400xf32, #tpu.memory_space<vmem>>, vector<1x400xf32>
    %26 = vector.broadcast %25 : vector<1x400xf32> to vector<16x400xf32>
    %27 = arith.addf %24, %26 : vector<16x400xf32>
    %cst_19 = arith.constant 0.000000e+00 : f32
    %28 = vector.broadcast %cst_19 : f32 to vector<16x400xf32>
    %29 = arith.maximumf %27, %28 : vector<16x400xf32>
    %30 = arith.truncf %29 : vector<16x400xf32> to vector<16x400xbf16>
    %c0_20 = arith.constant 0 : index
    %c0_21 = arith.constant 0 : index
    %31 = vector.load %arg9[%c0_20, %c0_21] : memref<400x784xbf16, #tpu.memory_space<vmem>>, vector<400x784xbf16>
    %cst_22 = arith.constant dense<0.000000e+00> : vector<16x784xf32>
    %32 = tpu.matmul %30, %31, %cst_22 {dimension_numbers = #tpu.dot_dimension_numbers<[1], [0], [0], [1], [0, 0, 1, 1], [], []>} : vector<16x400xbf16>, vector<400x784xbf16>, vector<16x784xf32> -> vector<16x784xf32>
    %c0_23 = arith.constant 0 : index
    %c0_24 = arith.constant 0 : index
    %33 = vector.load %arg10[%c0_23, %c0_24] : memref<1x784xf32, #tpu.memory_space<vmem>>, vector<1x784xf32>
    %34 = vector.broadcast %33 : vector<1x784xf32> to vector<16x784xf32>
    %35 = arith.addf %32, %34 : vector<16x784xf32>
    %36 = arith.negf %35 : vector<16x784xf32>
    %37 = math.exp %36 : vector<16x784xf32>
    %cst_25 = arith.constant 1.000000e+00 : f32
    %38 = vector.broadcast %cst_25 : f32 to vector<16x784xf32>
    %39 = arith.addf %38, %37 : vector<16x784xf32>
    %40 = arith.divf %38, %39 : vector<16x784xf32>
    %41 = arith.truncf %40 : vector<16x784xf32> to vector<16x784xbf16>
    %c0_26 = arith.constant 0 : index
    %c0_27 = arith.constant 0 : index
    %42 = vector.load %arg11[%c0_26, %c0_27] : memref<16x784xbf16, #tpu.memory_space<vmem>>, vector<16x784xbf16>
    tpu.vector_store %arg11[%c0_26, %c0_27], %41 {strides = array<i32>} : memref<16x784xbf16, #tpu.memory_space<vmem>>, vector<16x784xbf16>,
    %c0_28 = arith.constant 0 : index
    %c0_29 = arith.constant 0 : index
    %43 = vector.load %arg12[%c0_28, %c0_29] : memref<16x20xf32, #tpu.memory_space<vmem>>, vector<16x20xf32>
    tpu.vector_store %arg12[%c0_28, %c0_29], %14 {strides = array<i32>} : memref<16x20xf32, #tpu.memory_space<vmem>>, vector<16x20xf32>,
    %c0_30 = arith.constant 0 : index
    %c0_31 = arith.constant 0 : index
    %44 = vector.load %arg13[%c0_30, %c0_31] : memref<16x20xf32, #tpu.memory_space<vmem>>, vector<16x20xf32>
    tpu.vector_store %arg13[%c0_30, %c0_31], %15 {strides = array<i32>} : memref<16x20xf32, #tpu.memory_space<vmem>>, vector<16x20xf32>,
    return
  }
  func.func @transform_0(%arg0: i32) -> (i32, i32) {
    %c0_i32 = arith.constant 0 : i32
    %c0_i32_0 = arith.constant 0 : i32
    return %arg0, %c0_i32 : i32, i32
  }
  func.func @transform_1(%arg0: i32) -> (i32, i32) {
    %c0_i32 = arith.constant 0 : i32
    %c0_i32_0 = arith.constant 0 : i32
    return %arg0, %c0_i32 : i32, i32
  }
  func.func @transform_2(%arg0: i32) -> (i32, i32) {
    %c0_i32 = arith.constant 0 : i32
    %c0_i32_0 = arith.constant 0 : i32
    %c0_i32_1 = arith.constant 0 : i32
    return %c0_i32, %c0_i32_0 : i32, i32
  }
  func.func @transform_3(%arg0: i32) -> (i32, i32) {
    %c0_i32 = arith.constant 0 : i32
    %c0_i32_0 = arith.constant 0 : i32
    %c0_i32_1 = arith.constant 0 : i32
    return %c0_i32, %c0_i32_0 : i32, i32
  }
  func.func @transform_4(%arg0: i32) -> (i32, i32) {
    %c0_i32 = arith.constant 0 : i32
    %c0_i32_0 = arith.constant 0 : i32
    %c0_i32_1 = arith.constant 0 : i32
    return %c0_i32, %c0_i32_0 : i32, i32
  }
  func.func @transform_5(%arg0: i32) -> (i32, i32) {
    %c0_i32 = arith.constant 0 : i32
    %c0_i32_0 = arith.constant 0 : i32
    %c0_i32_1 = arith.constant 0 : i32
    return %c0_i32, %c0_i32_0 : i32, i32
  }
  func.func @transform_6(%arg0: i32) -> (i32, i32) {
    %c0_i32 = arith.constant 0 : i32
    %c0_i32_0 = arith.constant 0 : i32
    %c0_i32_1 = arith.constant 0 : i32
    return %c0_i32, %c0_i32_0 : i32, i32
  }
  func.func @transform_7(%arg0: i32) -> (i32, i32) {
    %c0_i32 = arith.constant 0 : i32
    %c0_i32_0 = arith.constant 0 : i32
    %c0_i32_1 = arith.constant 0 : i32
    return %c0_i32, %c0_i32_0 : i32, i32
  }
  func.func @transform_8(%arg0: i32) -> (i32, i32) {
    %c0_i32 = arith.constant 0 : i32
    %c0_i32_0 = arith.constant 0 : i32
    %c0_i32_1 = arith.constant 0 : i32
    return %c0_i32, %c0_i32_0 : i32, i32
  }
  func.func @transform_9(%arg0: i32) -> (i32, i32) {
    %c0_i32 = arith.constant 0 : i32
    %c0_i32_0 = arith.constant 0 : i32
    %c0_i32_1 = arith.constant 0 : i32
    return %c0_i32, %c0_i32_0 : i32, i32
  }
  func.func @transform_10(%arg0: i32) -> (i32, i32) {
    %c0_i32 = arith.constant 0 : i32
    %c0_i32_0 = arith.constant 0 : i32
    return %arg0, %c0_i32 : i32, i32
  }
  func.func @transform_11(%arg0: i32) -> (i32, i32) {
    %c0_i32 = arith.constant 0 : i32
    %c0_i32_0 = arith.constant 0 : i32
    return %arg0, %c0_i32 : i32, i32
  }
  func.func @transform_12(%arg0: i32) -> (i32, i32) {
    %c0_i32 = arith.constant 0 : i32
    %c0_i32_0 = arith.constant 0 : i32
    return %arg0, %c0_i32 : i32, i32
  }
}

</mosaic_0001>

<bundles_post_ra>
// kernel: vae_forward.1
= control target key start
LH: loop header
LB: loop body
LE: loop exit
PB: predicated region body
PF: predicated region fallthrough
CT: control target
= control target key end

     0   :  { %s5782_s21 = smov 0   ;;  %s7224_s0 = inlined_call_operand.vmem [shape: bf16[48,784], index: 0, kind: input, shape index: {}]   ;;  %s7225_s1 = inlined_call_operand.vmem [shape: f32[48,20], index: 1, kind: input, shape index: {}]   ;;  %s7226_s2 = inlined_call_operand.vmem [shape: bf16[784,400], index: 2, kind: input, shape index: {}]   ;;  %s7227_s3 = inlined_call_operand.vmem [shape: f32[1,400], index: 3, kind: input, shape index: {}]   ;;  %s7228_s4 = inlined_call_operand.vmem [shape: bf16[400,256], index: 4, kind: input, shape index: {}]   ;;  %s7229_s5 = inlined_call_operand.vmem [shape: f32[1,256], index: 5, kind: input, shape index: {}]   ;;  %s7230_s6 = inlined_call_operand.vmem [shape: bf16[20,400], index: 6, kind: input, shape index: {}]   ;;  %s7231_s7 = inlined_call_operand.vmem [shape: f32[1,400], index: 7, kind: input, shape index: {}]   ;;  %s7232_s8 = inlined_call_operand.vmem [shape: bf16[400,784], index: 8, kind: input, shape index: {}]   ;;  %s7233_s9 = inlined_call_operand.vmem [shape: f32[1,784], index: 9, kind: input, shape index: {}]   ;;  %s7234_s10 = inlined_call_operand.vmem [shape: bf16[48,784], index: 10, kind: output, shape index: {0}]   ;;  %s7235_s11 = inlined_call_operand.vmem [shape: f32[48,20], index: 11, kind: output, shape index: {1}]   ;;  %s7236_s12 = inlined_call_operand.vmem [shape: f32[48,20], index: 12, kind: output, shape index: {2}]  }
   0x1 LB: > { %s4419_s22 = sadd.s32 4294967295, %s5714_s21   ;;  %p4423_p0 = scmp.ge.s32.totalorder %s5714_s21, 1  ;;  %s5714_s21 = sphi %s5782_s21, %s23_s21  }
   0x2   : > { %p380_p1 = scmp.lt.s32.totalorder %s5714_s21, 4 }
   0x4   : > { %p381_p2 = pnand %p4423_p0, %p380_p1 }
   0x5   : > { %v5009_v0 = vld [vmem:[%s7226_s2 + $0x4] ss:$16 sps:$4 sm:$0xff] (!%p381_p2)   ;;  %v5011_v1 = vld [vmem:[%s7226_s2 + $0xc] ss:$16 sps:$4 sm:$0xff] (!%p381_p2)   ;;  %v5013_v2 = vld [vmem:[%s7226_s2] ss:$16 sps:$4 sm:$0xff] (!%p381_p2)  }
   0x6   : > { %384 = sbr.rel (%p381_p2) target bundleno = 1345 (0x541), region = 60  ;;  %1717 = vmatprep.subr.bf16.mxu0 (!%p381_p2), %v5009_v0  ;;  %v5014_v3 = vld [vmem:[%s7226_s2 + $0x8] ss:$16 sps:$4 sm:$0xff] (!%p381_p2)   ;;  %1889 = vmatprep.subr.bf16.mxu1 (!%p381_p2), %v5011_v1  ;;  %v5015_v4 = vld [vmem:[%s7226_s2 + $0x24] ss:$16 sps:$4 sm:$0xff] (!%p381_p2)   ;;  %s4424_s17 = sshll.u32 (!%p381_p2), %s4419_s22, 1 }
   0x7   : > { %1718 = vmatpush1.bf16.msra.mxu0 (!%p381_p2), %v5013_v2  ;;  %1890 = vmatpush1.bf16.msra.mxu1 (!%p381_p2), %v5014_v3  ;;  %v5017_v5 = vld [vmem:[%s7226_s2 + $0x2c] ss:$16 sps:$4 sm:$0xff] (!%p381_p2)   ;;  %v5019_v6 = vld [vmem:[%s7226_s2 + $0x20] ss:$16 sps:$4 sm:$0xff] (!%p381_p2)   ;;  %v5020_v7 = vld [vmem:[%s7226_s2 + $0x28] ss:$16 sps:$4 sm:$0xff] (!%p381_p2)  }
   0x8   : > { %1719 = vmatprep.subr.bf16.mxu0 (!%p381_p2), %v5015_v4  ;;  %1891 = vmatprep.subr.bf16.mxu1 (!%p381_p2), %v5017_v5  ;;  %v5021_v8 = vld [vmem:[%s7226_s2 + $0x44] ss:$16 sps:$4 sm:$0xff] (!%p381_p2)   ;;  %v5023_v9 = vld [vmem:[%s7226_s2 + $0x4c] ss:$16 sps:$4 sm:$0xff] (!%p381_p2)   ;;  %v5025_v10 = vld [vmem:[%s7226_s2 + $0x40] ss:$16 sps:$4 sm:$0xff] (!%p381_p2)  }
   0x9   : > { %v5026_v11 = vld [vmem:[%s7226_s2 + $0x48] ss:$16 sps:$4 sm:$0xff] (!%p381_p2)   ;;  %v5027_v12 = vld [vmem:[%s7226_s2 + $0x64] ss:$16 sps:$4 sm:$0xff] (!%p381_p2)   ;;  %v5029_v13 = vld [vmem:[%s7226_s2 + $0x6c] ss:$16 sps:$4 sm:$0xff] (!%p381_p2)  }
   0xa   : > { %v5031_v14 = vld [vmem:[%s7226_s2 + $0x60] ss:$16 sps:$4 sm:$0xff] (!%p381_p2)   ;;  %v5032_v15 = vld [vmem:[%s7226_s2 + $0x68] ss:$16 sps:$4 sm:$0xff] (!%p381_p2)   ;;  %v5033_v16 = vld [vmem:[%s7226_s2 + $0x84] ss:$16 sps:$4 sm:$0xff] (!%p381_p2)  }
   0xb   : > { %1720 = vmatpush1.bf16.msra.mxu0 (!%p381_p2), %v5019_v6  ;;  %1892 = vmatpush1.bf16.msra.mxu1 (!%p381_p2), %v5020_v7  ;;  %v5035_v17 = vld [vmem:[%s7226_s2 + $0x8c] ss:$16 sps:$4 sm:$0xff] (!%p381_p2)   ;;  %v5037_v18 = vld [vmem:[%s7226_s2 + $0x80] ss:$16 sps:$4 sm:$0xff] (!%p381_p2)   ;;  %v5038_v19 = vld [vmem:[%s7226_s2 + $0x88] ss:$16 sps:$4 sm:$0xff] (!%p381_p2)  }
   0xc   : > { %1721 = vmatprep.subr.bf16.mxu0 (!%p381_p2), %v5021_v8  ;;  %1893 = vmatprep.subr.bf16.mxu1 (!%p381_p2), %v5023_v9  ;;  %v5039_v20 = vld [vmem:[%s7226_s2 + $0xa4] ss:$16 sps:$4 sm:$0xff] (!%p381_p2)   ;;  %v5041_v21 = vld [vmem:[%s7226_s2 + $0xac] ss:$16 sps:$4 sm:$0xff] (!%p381_p2)   ;;  %v5043_v22 = vld [vmem:[%s7226_s2 + $0xa0] ss:$16 sps:$4 sm:$0xff] (!%p381_p2)  }
   0xd   : > { %v5044_v23 = vld [vmem:[%s7226_s2 + $0xa8] ss:$16 sps:$4 sm:$0xff]   ;;  %v5045_v24 = vld [vmem:[%s7226_s2 + $0xc4] ss:$16 sps:$4 sm:$0xff]   ;;  %v5047_v25 = vld [vmem:[%s7226_s2 + $0xcc] ss:$16 sps:$4 sm:$0xff]  }
   0xe   : > { %v5049_v26 = vld [vmem:[%s7226_s2 + $0xc0] ss:$16 sps:$4 sm:$0xff]   ;;  %v5050_v27 = vld [vmem:[%s7226_s2 + $0xc8] ss:$16 sps:$4 sm:$0xff]   ;;  %v5051_v28 = vld [vmem:[%s7226_s2 + $0xe4] ss:$16 sps:$4 sm:$0xff]  }
   0xf   : > { %1722 = vmatpush1.bf16.msra.mxu0 %v5025_v10  ;;  %1894 = vmatpush1.bf16.msra.mxu1 %v5026_v11  ;;  %v5053_v29 = vld [vmem:[%s7226_s2 + $0xec] ss:$16 sps:$4 sm:$0xff]   ;;  %v5055_v30 = vld [vmem:[%s7226_s2 + $0xe0] ss:$16 sps:$4 sm:$0xff]   ;;  %v5056_v31 = vld [vmem:[%s7226_s2 + $0xe8] ss:$16 sps:$4 sm:$0xff]  }
  0x10   : > { %1723 = vmatprep.subr.bf16.mxu0 %v5027_v12  ;;  %1895 = vmatprep.subr.bf16.mxu1 %v5029_v13  ;;  %v5057_v32 = vld [vmem:[%s7226_s2 + $0x104] ss:$16 sps:$4 sm:$0xff]   ;;  %p440_p3 = scmp.lt.s32.totalorder %s4424_s17, 5  ;;  %v5059_v33 = vld [vmem:[%s7226_s2 + $0x10c] ss:$16 sps:$4 sm:$0xff]   ;;  %vm1713_vm0 = vcmask 130048  }
  0x11   : > { %v5061_v34 = vld [vmem:[%s7226_s2 + $0x100] ss:$16 sps:$4 sm:$0xff]   ;;  %v5062_v35 = vld [vmem:[%s7226_s2 + $0x108] ss:$16 sps:$4 sm:$0xff]   ;;  %v5063_v36 = vld [vmem:[%s7226_s2 + $0x124] ss:$16 sps:$4 sm:$0xff]  }
  0x12   : > { %s7238_s17 = smov (!%p440_p3, %s4424_s17), 5  ;;  %v5065_v37 = vld [vmem:[%s7226_s2 + $0x12c] ss:$16 sps:$4 sm:$0xff]   ;;  %v5067_v38 = vld [vmem:[%s7226_s2 + $0x120] ss:$16 sps:$4 sm:$0xff]   ;;  %vm2549_vm1 = vcmask 1041408  }
  0x13   : > { %1724 = vmatpush1.bf16.msra.mxu0 %v5031_v14  ;;  %1896 = vmatpush1.bf16.msra.mxu1 %v5032_v15  ;;  %v5068_v39 = vld [vmem:[%s7226_s2 + $0x128] ss:$16 sps:$4 sm:$0xff]   ;;  %v5069_v40 = vld [vmem:[%s7226_s2 + $0x144] ss:$16 sps:$4 sm:$0xff]   ;;  %s4999_s26 = smul.u32 28, %s7238_s17  ;;  %s4427_s15 = sshll.u32 %s7238_s17, 3 }
  0x14   : > { %1725 = vmatprep.subr.bf16.mxu0 %v5033_v16  ;;  %1897 = vmatprep.subr.bf16.mxu1 %v5035_v17  ;;  %v5071_v41 = vld [vmem:[%s7226_s2 + $0x14c] ss:$16 sps:$4 sm:$0xff]   ;;  %v5073_v42 = vld [vmem:[%s7226_s2 + $0x140] ss:$16 sps:$4 sm:$0xff]   ;;  %v5074_v43 = vld [vmem:[%s7226_s2 + $0x148] ss:$16 sps:$4 sm:$0xff]   ;;  %s463_s18 = scalar_lea.vmem %s7235_s11, %s4427_s15  ;;  %s469_s24 = scalar_lea.vmem %s7236_s12, %s4427_s15 }
  0x15   : > { %v5075_v44 = vld [vmem:[%s7226_s2 + $0x164] ss:$16 sps:$4 sm:$0xff]   ;;  %s5935_s19 = scalar_lea.vmem %s7224_s0, %s4999_s26  ;;  %v5077_v45 = vld [vmem:[%s7226_s2 + $0x16c] ss:$16 sps:$4 sm:$0xff]   ;;  %v5079_v46 = vld [vmem:[%s7226_s2 + $0x160] ss:$16 sps:$4 sm:$0xff]   ;;  %s450_s22 = scalar_lea.vmem %s7225_s1, %s4427_s15 }
  0x16   : > { %v5080_v47 = vld [vmem:[%s7226_s2 + $0x168] ss:$16 sps:$4 sm:$0xff]   ;;  %v5107_v48 = vld [vmem:[%s5935_s19 + $0x4] ss:$28 sps:$4 sm:$0xff]   ;;  %v5083_v50 = vld [vmem:[%s7226_s2 + $0x18c] ss:$16 sps:$4 sm:$0xff]   ;;  %s7205_s14 = scalar_lea.vmem %s7234_s10, %s4999_s26 }
  0x17   : > { %1726 = vmatpush1.bf16.msra.mxu0 %v5037_v18  ;;  %1898 = vmatpush1.bf16.msra.mxu1 %v5038_v19  ;;  %v5081_v49 = vld [vmem:[%s7226_s2 + $0x184] ss:$16 sps:$4 sm:$0xff]   ;;  %v5085_v51 = vld [vmem:[%s7226_s2 + $0x180] ss:$16 sps:$4 sm:$0xff]   ;;  %v5086_v52 = vld [vmem:[%s7226_s2 + $0x188] ss:$16 sps:$4 sm:$0xff]  }
  0x18   : > { %1727 = vmatprep.subr.bf16.mxu0 %v5039_v20  ;;  %1899 = vmatprep.subr.bf16.mxu1 %v5041_v21  ;;  %v5087_v53 = vld [vmem:[%s7226_s2 + $0x1a4] ss:$16 sps:$4 sm:$0xff]   ;;  %v5089_v54 = vld [vmem:[%s7226_s2 + $0x1ac] ss:$16 sps:$4 sm:$0xff]   ;;  %v5091_v55 = vld [vmem:[%s7226_s2 + $0x1a0] ss:$16 sps:$4 sm:$0xff]  }
  0x19   : > { %1749 = vmatprep.mubr.bf16.mxu0 %v5107_v48  ;;  %1921 = vmatprep.mubr.bf16.mxu1 %v5107_v48  ;;  %v5092_v56 = vld [vmem:[%s7226_s2 + $0x1a8] ss:$16 sps:$4 sm:$0xff]   ;;  %v5093_v57 = vld [vmem:[%s7226_s2 + $0x1c4] ss:$16 sps:$4 sm:$0xff]   ;;  %v5095_v58 = vld [vmem:[%s7226_s2 + $0x1cc] ss:$16 sps:$4 sm:$0xff]  }
  0x1a   : > { %v5097_v59 = vld [vmem:[%s7226_s2 + $0x1c0] ss:$16 sps:$4 sm:$0xff]   ;;  %v5098_v60 = vld [vmem:[%s7226_s2 + $0x1c8] ss:$16 sps:$4 sm:$0xff]   ;;  %v5099_v61 = vld [vmem:[%s7226_s2 + $0x1e4] ss:$16 sps:$4 sm:$0xff]  }
  0x1b   : > { %1728 = vmatpush1.bf16.msra.mxu0 %v5043_v22  ;;  %1900 = vmatpush1.bf16.msra.mxu1 %v5044_v23  ;;  %v5101_v62 = vld [vmem:[%s7226_s2 + $0x1ec] ss:$16 sps:$4 sm:$0xff]   ;;  %v5103_v63 = vld [vmem:[%s7226_s2 + $0x1e0] ss:$16 sps:$4 sm:$0xff]   ;;  %v5104_v0 = vld [vmem:[%s7226_s2 + $0x1e8] ss:$16 sps:$4 sm:$0xff]  }
  0x1c   : > { %1729 = vmatprep.subr.bf16.mxu0 %v5045_v24  ;;  %1901 = vmatprep.subr.bf16.mxu1 %v5047_v25  ;;  %v5110_v1 = vld [vmem:[%s7226_s2 + $0x204] ss:$16 sps:$4 sm:$0xff]   ;;  %v5113_v2 = vld [vmem:[%s7226_s2 + $0x20c] ss:$16 sps:$4 sm:$0xff]   ;;  %v5108_v4 = vld [vmem:[%s7226_s2 + $0x200] ss:$16 sps:$4 sm:$0xff]  }
  0x1d   : > { %v5105_v3 = vld [vmem:[%s5935_s19] ss:$28 sps:$4 sm:$0xff]   ;;  %v5111_v5 = vld [vmem:[%s7226_s2 + $0x208] ss:$16 sps:$4 sm:$0xff]   ;;  %v5116_v6 = vld [vmem:[%s7226_s2 + $0x224] ss:$16 sps:$4 sm:$0xff]  }
  0x1e   : > { %v5119_v7 = vld [vmem:[%s7226_s2 + $0x22c] ss:$16 sps:$4 sm:$0xff]   ;;  %v5114_v8 = vld [vmem:[%s7226_s2 + $0x220] ss:$16 sps:$4 sm:$0xff]   ;;  %v5117_v9 = vld [vmem:[%s7226_s2 + $0x228] ss:$16 sps:$4 sm:$0xff]  }
  0x1f   : > { %1730 = vmatpush1.bf16.msra.mxu0 %v5049_v26  ;;  %1902 = vmatpush1.bf16.msra.mxu1 %v5050_v27  ;;  %v5122_v10 = vld [vmem:[%s7226_s2 + $0x244] ss:$16 sps:$4 sm:$0xff]   ;;  %v5125_v11 = vld [vmem:[%s7226_s2 + $0x24c] ss:$16 sps:$4 sm:$0xff]   ;;  %v5120_v12 = vld [vmem:[%s7226_s2 + $0x240] ss:$16 sps:$4 sm:$0xff]  }
  0x20   : > { %1731 = vmatprep.subr.bf16.mxu0 %v5051_v28  ;;  %1903 = vmatprep.subr.bf16.mxu1 %v5053_v29  ;;  %v5123_v13 = vld [vmem:[%s7226_s2 + $0x248] ss:$16 sps:$4 sm:$0xff]   ;;  %v5128_v14 = vld [vmem:[%s7226_s2 + $0x264] ss:$16 sps:$4 sm:$0xff]   ;;  %v5131_v15 = vld [vmem:[%s7226_s2 + $0x26c] ss:$16 sps:$4 sm:$0xff]  }
  0x21   : > { %v5126_v16 = vld [vmem:[%s7226_s2 + $0x260] ss:$16 sps:$4 sm:$0xff]   ;;  %v5129_v17 = vld [vmem:[%s7226_s2 + $0x268] ss:$16 sps:$4 sm:$0xff]   ;;  %v5134_v18 = vld [vmem:[%s7226_s2 + $0x284] ss:$16 sps:$4 sm:$0xff]  }
  0x22   : > { %v5137_v19 = vld [vmem:[%s7226_s2 + $0x28c] ss:$16 sps:$4 sm:$0xff]   ;;  %v5132_v20 = vld [vmem:[%s7226_s2 + $0x280] ss:$16 sps:$4 sm:$0xff]   ;;  %v5135_v21 = vld [vmem:[%s7226_s2 + $0x288] ss:$16 sps:$4 sm:$0xff]  }
  0x23   : > { %1732 = vmatpush1.bf16.msra.mxu0 %v5055_v30  ;;  %1904 = vmatpush1.bf16.msra.mxu1 %v5056_v31  ;;  %v5140_v22 = vld [vmem:[%s7226_s2 + $0x2a4] ss:$16 sps:$4 sm:$0xff]   ;;  %v5143_v23 = vld [vmem:[%s7226_s2 + $0x2ac] ss:$16 sps:$4 sm:$0xff]   ;;  %v5138_v24 = vld [vmem:[%s7226_s2 + $0x2a0] ss:$16 sps:$4 sm:$0xff]  }
  0x24   : > { %1733 = vmatprep.subr.bf16.mxu0 %v5057_v32  ;;  %1905 = vmatprep.subr.bf16.mxu1 %v5059_v33  ;;  %v5141_v25 = vld [vmem:[%s7226_s2 + $0x2a8] ss:$16 sps:$4 sm:$0xff]   ;;  %v5146_v26 = vld [vmem:[%s7226_s2 + $0x2c4] ss:$16 sps:$4 sm:$0xff]   ;;  %v5149_v27 = vld [vmem:[%s7226_s2 + $0x2cc] ss:$16 sps:$4 sm:$0xff]  }
  0x25   : > { %v5144_v28 = vld [vmem:[%s7226_s2 + $0x2c0] ss:$16 sps:$4 sm:$0xff]   ;;  %v5147_v29 = vld [vmem:[%s7226_s2 + $0x2c8] ss:$16 sps:$4 sm:$0xff]   ;;  %v5152_v31 = vld [vmem:[%s7226_s2 + $0x2e4] ss:$16 sps:$4 sm:$0xff]  }
  0x26   : > { %v5206_v30 = vld [vmem:[%s5935_s19 + $0xc] ss:$28 sps:$4 sm:$0xff]   ;;  %v5150_v33 = vld [vmem:[%s7226_s2 + $0x2e0] ss:$16 sps:$4 sm:$0xff]   ;;  %vm2545_vm2 = vcmask 162816   ;;  %vm4271_vm3 = vcmask 125952  }
  0x27   : > { %1734 = vmatpush1.bf16.msra.mxu0 %v5061_v34  ;;  %1906 = vmatpush1.bf16.msra.mxu1 %v5062_v35  ;;  %v5155_v32 = vld [vmem:[%s7226_s2 + $0x2ec] ss:$16 sps:$4 sm:$0xff]   ;;  %v5153_v34 = vld [vmem:[%s7226_s2 + $0x2e8] ss:$16 sps:$4 sm:$0xff]   ;;  %v5158_v35 = vld [vmem:[%s7226_s2 + $0x304] ss:$16 sps:$4 sm:$0xff]  }
  0x28   : > { %1735 = vmatprep.subr.bf16.mxu0 %v5063_v36  ;;  %1907 = vmatprep.subr.bf16.mxu1 %v5065_v37  ;;  %v5161_v36 = vld [vmem:[%s7226_s2 + $0x30c] ss:$16 sps:$4 sm:$0xff]   ;;  %v5156_v37 = vld [vmem:[%s7226_s2 + $0x300] ss:$16 sps:$4 sm:$0xff]  }
  0x29   : > { %v5179_v48 = vld [vmem:[%s7226_s2 + $0x36c] ss:$16 sps:$4 sm:$0xff]  }
  0x2b   : > { %1736 = vmatpush1.bf16.msra.mxu0 %v5067_v38  ;;  %1908 = vmatpush1.bf16.msra.mxu1 %v5068_v39  ;;  %v5159_v38 = vld [vmem:[%s7226_s2 + $0x308] ss:$16 sps:$4 sm:$0xff]   ;;  %v5164_v39 = vld [vmem:[%s7226_s2 + $0x324] ss:$16 sps:$4 sm:$0xff]  }
  0x2c   : > { %1737 = vmatprep.subr.bf16.mxu0 %v5069_v40  ;;  %1909 = vmatprep.subr.bf16.mxu1 %v5071_v41  ;;  %v5167_v40 = vld [vmem:[%s7226_s2 + $0x32c] ss:$16 sps:$4 sm:$0xff]   ;;  %v5162_v41 = vld [vmem:[%s7226_s2 + $0x320] ss:$16 sps:$4 sm:$0xff]  }
  0x2f   : > { %1738 = vmatpush1.bf16.msra.mxu0 %v5073_v42  ;;  %1910 = vmatpush1.bf16.msra.mxu1 %v5074_v43  ;;  %v5165_v42 = vld [vmem:[%s7226_s2 + $0x328] ss:$16 sps:$4 sm:$0xff]   ;;  %v5170_v43 = vld [vmem:[%s7226_s2 + $0x344] ss:$16 sps:$4 sm:$0xff]  }
  0x30   : > { %1739 = vmatprep.subr.bf16.mxu0 %v5075_v44  ;;  %1911 = vmatprep.subr.bf16.mxu1 %v5077_v45  ;;  %v5173_v44 = vld [vmem:[%s7226_s2 + $0x34c] ss:$16 sps:$4 sm:$0xff]   ;;  %v5168_v45 = vld [vmem:[%s7226_s2 + $0x340] ss:$16 sps:$4 sm:$0xff]  }
  0x33   : > { %1740 = vmatpush1.bf16.msra.mxu0 %v5079_v46  ;;  %1912 = vmatpush1.bf16.msra.mxu1 %v5080_v47  ;;  %v5171_v46 = vld [vmem:[%s7226_s2 + $0x348] ss:$16 sps:$4 sm:$0xff]   ;;  %v5176_v47 = vld [vmem:[%s7226_s2 + $0x364] ss:$16 sps:$4 sm:$0xff]  }
  0x34   : > { %1741 = vmatprep.subr.bf16.mxu0 %v5081_v49  ;;  %1913 = vmatprep.subr.bf16.mxu1 %v5083_v50  ;;  %v5174_v49 = vld [vmem:[%s7226_s2 + $0x360] ss:$16 sps:$4 sm:$0xff]   ;;  %v5177_v50 = vld [vmem:[%s7226_s2 + $0x368] ss:$16 sps:$4 sm:$0xff]  }
  0x37   : > { %1742 = vmatpush1.bf16.msra.mxu0 %v5085_v51  ;;  %1914 = vmatpush1.bf16.msra.mxu1 %v5086_v52  ;;  %v5182_v51 = vld [vmem:[%s7226_s2 + $0x384] ss:$16 sps:$4 sm:$0xff]   ;;  %v5185_v52 = vld [vmem:[%s7226_s2 + $0x38c] ss:$16 sps:$4 sm:$0xff]  }
  0x38   : > { %1743 = vmatprep.subr.bf16.mxu0 %v5087_v53  ;;  %1915 = vmatprep.subr.bf16.mxu1 %v5089_v54  ;;  %v5180_v53 = vld [vmem:[%s7226_s2 + $0x380] ss:$16 sps:$4 sm:$0xff]   ;;  %v5183_v54 = vld [vmem:[%s7226_s2 + $0x388] ss:$16 sps:$4 sm:$0xff]  }
  0x3b   : > { %1744 = vmatpush1.bf16.msra.mxu0 %v5091_v55  ;;  %1916 = vmatpush1.bf16.msra.mxu1 %v5092_v56  ;;  %v5188_v55 = vld [vmem:[%s7226_s2 + $0x3a4] ss:$16 sps:$4 sm:$0xff]   ;;  %v5191_v56 = vld [vmem:[%s7226_s2 + $0x3ac] ss:$16 sps:$4 sm:$0xff]  }
  0x3c   : > { %1745 = vmatprep.subr.bf16.mxu0 %v5093_v57  ;;  %1917 = vmatprep.subr.bf16.mxu1 %v5095_v58  ;;  %v5186_v57 = vld [vmem:[%s7226_s2 + $0x3a0] ss:$16 sps:$4 sm:$0xff]   ;;  %v5189_v58 = vld [vmem:[%s7226_s2 + $0x3a8] ss:$16 sps:$4 sm:$0xff]  }
  0x3f   : > { %1746 = vmatpush1.bf16.msra.mxu0 %v5097_v59  ;;  %1918 = vmatpush1.bf16.msra.mxu1 %v5098_v60  ;;  %v5194_v59 = vld [vmem:[%s7226_s2 + $0x3c4] ss:$16 sps:$4 sm:$0xff]   ;;  %v5197_v60 = vld [vmem:[%s7226_s2 + $0x3cc] ss:$16 sps:$4 sm:$0xff]  }
  0x40   : > { %1747 = vmatprep.subr.bf16.mxu0 %v5099_v61  ;;  %1919 = vmatprep.subr.bf16.mxu1 %v5101_v62  ;;  %v5192_v61 = vld [vmem:[%s7226_s2 + $0x3c0] ss:$16 sps:$4 sm:$0xff]   ;;  %v5195_v62 = vld [vmem:[%s7226_s2 + $0x3c8] ss:$16 sps:$4 sm:$0xff]  }
  0x43   : > { %1748 = vmatpush1.bf16.msra.mxu0 %v5103_v63  ;;  %1920 = vmatpush1.bf16.msra.mxu1 %v5104_v0  ;;  %v5200_v63 = vld [vmem:[%s7226_s2 + $0x3e4] ss:$16 sps:$4 sm:$0xff]   ;;  %v5203_v0 = vld [vmem:[%s7226_s2 + $0x3ec] ss:$16 sps:$4 sm:$0xff]  }
  0x44   : > { %1760 = vmatprep.subr.bf16.mxu0 %v5110_v1  ;;  %1932 = vmatprep.subr.bf16.mxu1 %v5113_v2  ;;  %v5198_v1 = vld [vmem:[%s7226_s2 + $0x3e0] ss:$16 sps:$4 sm:$0xff]   ;;  %v5201_v2 = vld [vmem:[%s7226_s2 + $0x3e8] ss:$16 sps:$4 sm:$0xff]  }
  0x46   : > { %1750 = vmatmul.mubr.bf16.vlgmr.msra.gmra.mrb[0].mxu0 %v5105_v3  ;;  %1922 = vmatmul.mubr.bf16.vlgmr.msra.gmra.mrb[0].mxu1 %v5105_v3  ;;  %v5209_v3 = vld [vmem:[%s7226_s2 + $0x404] ss:$16 sps:$4 sm:$0xff]  }
  0x47   : > { %1761 = vmatpush1.bf16.msra.mxu0 %v5108_v4  ;;  %1933 = vmatpush1.bf16.msra.mxu1 %v5111_v5  ;;  %v5212_v4 = vld [vmem:[%s7226_s2 + $0x40c] ss:$16 sps:$4 sm:$0xff]   ;;  %v5204_v5 = vld [vmem:[%s5935_s19 + $0x8] ss:$28 sps:$4 sm:$0xff]  }
  0x48   : > { %1762 = vmatprep.subr.bf16.mxu0 %v5116_v6  ;;  %1934 = vmatprep.subr.bf16.mxu1 %v5119_v7  ;;  %v5207_v6 = vld [vmem:[%s7226_s2 + $0x400] ss:$16 sps:$4 sm:$0xff]   ;;  %v5210_v7 = vld [vmem:[%s7226_s2 + $0x408] ss:$16 sps:$4 sm:$0xff]  }
  0x49   : > { %1792 = vmatprep.mubr.bf16.mxu0 %v5206_v30  ;;  %1964 = vmatprep.mubr.bf16.mxu1 %v5206_v30  ;;  %v5248_v30 = vld [vmem:[%s7226_s2 + $0x4cc] ss:$16 sps:$4 sm:$0xff]  }
  0x4b   : > { %1763 = vmatpush1.bf16.msra.mxu0 %v5114_v8  ;;  %1935 = vmatpush1.bf16.msra.mxu1 %v5117_v9  ;;  %v5215_v8 = vld [vmem:[%s7226_s2 + $0x424] ss:$16 sps:$4 sm:$0xff]   ;;  %v5218_v9 = vld [vmem:[%s7226_s2 + $0x42c] ss:$16 sps:$4 sm:$0xff]  }
  0x4c   : > { %1764 = vmatprep.subr.bf16.mxu0 %v5122_v10  ;;  %1936 = vmatprep.subr.bf16.mxu1 %v5125_v11  ;;  %v5213_v10 = vld [vmem:[%s7226_s2 + $0x420] ss:$16 sps:$4 sm:$0xff]   ;;  %v5216_v11 = vld [vmem:[%s7226_s2 + $0x428] ss:$16 sps:$4 sm:$0xff]  }
  0x4f   : > { %1765 = vmatpush1.bf16.msra.mxu0 %v5120_v12  ;;  %1937 = vmatpush1.bf16.msra.mxu1 %v5123_v13  ;;  %v5305_v12 = vld [vmem:[%s5935_s19 + $0x14] ss:$28 sps:$4 sm:$0xff]  }
  0x50   : > { %1766 = vmatprep.subr.bf16.mxu0 %v5128_v14  ;;  %1938 = vmatprep.subr.bf16.mxu1 %v5131_v15  ;;  %v5221_v13 = vld [vmem:[%s7226_s2 + $0x444] ss:$16 sps:$4 sm:$0xff]   ;;  %v5224_v14 = vld [vmem:[%s7226_s2 + $0x44c] ss:$16 sps:$4 sm:$0xff]   ;;  %v5219_v15 = vld [vmem:[%s7226_s2 + $0x440] ss:$16 sps:$4 sm:$0xff]  }
  0x53   : > { %1767 = vmatpush1.bf16.msra.mxu0 %v5126_v16  ;;  %1939 = vmatpush1.bf16.msra.mxu1 %v5129_v17  ;;  %v5222_v16 = vld [vmem:[%s7226_s2 + $0x448] ss:$16 sps:$4 sm:$0xff]   ;;  %v5227_v17 = vld [vmem:[%s7226_s2 + $0x464] ss:$16 sps:$4 sm:$0xff]  }
  0x54   : > { %1768 = vmatprep.subr.bf16.mxu0 %v5134_v18  ;;  %1940 = vmatprep.subr.bf16.mxu1 %v5137_v19  ;;  %v5230_v18 = vld [vmem:[%s7226_s2 + $0x46c] ss:$16 sps:$4 sm:$0xff]   ;;  %v5225_v19 = vld [vmem:[%s7226_s2 + $0x460] ss:$16 sps:$4 sm:$0xff]  }
  0x57   : > { %1769 = vmatpush1.bf16.msra.mxu0 %v5132_v20  ;;  %1941 = vmatpush1.bf16.msra.mxu1 %v5135_v21  ;;  %v5228_v20 = vld [vmem:[%s7226_s2 + $0x468] ss:$16 sps:$4 sm:$0xff]   ;;  %v5233_v21 = vld [vmem:[%s7226_s2 + $0x484] ss:$16 sps:$4 sm:$0xff]  }
  0x58   : > { %1770 = vmatprep.subr.bf16.mxu0 %v5140_v22  ;;  %1942 = vmatprep.subr.bf16.mxu1 %v5143_v23  ;;  %v5236_v22 = vld [vmem:[%s7226_s2 + $0x48c] ss:$16 sps:$4 sm:$0xff]   ;;  %v5231_v23 = vld [vmem:[%s7226_s2 + $0x480] ss:$16 sps:$4 sm:$0xff]  }
  0x5b   : > { %1771 = vmatpush1.bf16.msra.mxu0 %v5138_v24  ;;  %1943 = vmatpush1.bf16.msra.mxu1 %v5141_v25  ;;  %v5234_v24 = vld [vmem:[%s7226_s2 + $0x488] ss:$16 sps:$4 sm:$0xff]   ;;  %v5239_v25 = vld [vmem:[%s7226_s2 + $0x4a4] ss:$16 sps:$4 sm:$0xff]  }
  0x5c   : > { %1772 = vmatprep.subr.bf16.mxu0 %v5146_v26  ;;  %1944 = vmatprep.subr.bf16.mxu1 %v5149_v27  ;;  %v5242_v26 = vld [vmem:[%s7226_s2 + $0x4ac] ss:$16 sps:$4 sm:$0xff]   ;;  %v5237_v27 = vld [vmem:[%s7226_s2 + $0x4a0] ss:$16 sps:$4 sm:$0xff]  }
  0x5f   : > { %1773 = vmatpush1.bf16.msra.mxu0 %v5144_v28  ;;  %1945 = vmatpush1.bf16.msra.mxu1 %v5147_v29  ;;  %v5240_v28 = vld [vmem:[%s7226_s2 + $0x4a8] ss:$16 sps:$4 sm:$0xff]   ;;  %v5245_v29 = vld [vmem:[%s7226_s2 + $0x4c4] ss:$16 sps:$4 sm:$0xff]  }
  0x60   : > { %1774 = vmatprep.subr.bf16.mxu0 %v5152_v31  ;;  %1946 = vmatprep.subr.bf16.mxu1 %v5155_v32  ;;  %v5243_v31 = vld [vmem:[%s7226_s2 + $0x4c0] ss:$16 sps:$4 sm:$0xff]   ;;  %v5246_v32 = vld [vmem:[%s7226_s2 + $0x4c8] ss:$16 sps:$4 sm:$0xff]  }
  0x63   : > { %1775 = vmatpush1.bf16.msra.mxu0 %v5150_v33  ;;  %1947 = vmatpush1.bf16.msra.mxu1 %v5153_v34  ;;  %v5251_v33 = vld [vmem:[%s7226_s2 + $0x4e4] ss:$16 sps:$4 sm:$0xff]   ;;  %v5254_v34 = vld [vmem:[%s7226_s2 + $0x4ec] ss:$16 sps:$4 sm:$0xff]  }
  0x64   : > { %1776 = vmatprep.subr.bf16.mxu0 %v5158_v35  ;;  %1948 = vmatprep.subr.bf16.mxu1 %v5161_v36  ;;  %v5249_v35 = vld [vmem:[%s7226_s2 + $0x4e0] ss:$16 sps:$4 sm:$0xff]   ;;  %v5252_v36 = vld [vmem:[%s7226_s2 + $0x4e8] ss:$16 sps:$4 sm:$0xff]  }
  0x67   : > { %1777 = vmatpush1.bf16.msra.mxu0 %v5156_v37  ;;  %1949 = vmatpush1.bf16.msra.mxu1 %v5159_v38  ;;  %v5257_v37 = vld [vmem:[%s7226_s2 + $0x504] ss:$16 sps:$4 sm:$0xff]   ;;  %v5260_v38 = vld [vmem:[%s7226_s2 + $0x50c] ss:$16 sps:$4 sm:$0xff]  }
  0x68   : > { %1778 = vmatprep.subr.bf16.mxu0 %v5164_v39  ;;  %1950 = vmatprep.subr.bf16.mxu1 %v5167_v40  ;;  %v5255_v39 = vld [vmem:[%s7226_s2 + $0x500] ss:$16 sps:$4 sm:$0xff]   ;;  %v5258_v40 = vld [vmem:[%s7226_s2 + $0x508] ss:$16 sps:$4 sm:$0xff]  }
  0x6b   : > { %1779 = vmatpush1.bf16.msra.mxu0 %v5162_v41  ;;  %1951 = vmatpush1.bf16.msra.mxu1 %v5165_v42  ;;  %v5263_v41 = vld [vmem:[%s7226_s2 + $0x524] ss:$16 sps:$4 sm:$0xff]   ;;  %v5266_v42 = vld [vmem:[%s7226_s2 + $0x52c] ss:$16 sps:$4 sm:$0xff]  }
  0x6c   : > { %1780 = vmatprep.subr.bf16.mxu0 %v5170_v43  ;;  %1952 = vmatprep.subr.bf16.mxu1 %v5173_v44  ;;  %v5261_v43 = vld [vmem:[%s7226_s2 + $0x520] ss:$16 sps:$4 sm:$0xff]   ;;  %v5264_v44 = vld [vmem:[%s7226_s2 + $0x528] ss:$16 sps:$4 sm:$0xff]  }
  0x6f   : > { %1781 = vmatpush1.bf16.msra.mxu0 %v5168_v45  ;;  %1953 = vmatpush1.bf16.msra.mxu1 %v5171_v46  ;;  %v5269_v45 = vld [vmem:[%s7226_s2 + $0x544] ss:$16 sps:$4 sm:$0xff]   ;;  %v5272_v46 = vld [vmem:[%s7226_s2 + $0x54c] ss:$16 sps:$4 sm:$0xff]  }
  0x70   : > { %1782 = vmatprep.subr.bf16.mxu0 %v5176_v47  ;;  %1954 = vmatprep.subr.bf16.mxu1 %v5179_v48  ;;  %v5267_v47 = vld [vmem:[%s7226_s2 + $0x540] ss:$16 sps:$4 sm:$0xff]   ;;  %v5270_v48 = vld [vmem:[%s7226_s2 + $0x548] ss:$16 sps:$4 sm:$0xff]  }
  0x73   : > { %1783 = vmatpush1.bf16.msra.mxu0 %v5174_v49  ;;  %1955 = vmatpush1.bf16.msra.mxu1 %v5177_v50  ;;  %v5275_v49 = vld [vmem:[%s7226_s2 + $0x564] ss:$16 sps:$4 sm:$0xff]   ;;  %v5278_v50 = vld [vmem:[%s7226_s2 + $0x56c] ss:$16 sps:$4 sm:$0xff]  }
  0x74   : > { %1784 = vmatprep.subr.bf16.mxu0 %v5182_v51  ;;  %1956 = vmatprep.subr.bf16.mxu1 %v5185_v52  ;;  %v5273_v51 = vld [vmem:[%s7226_s2 + $0x560] ss:$16 sps:$4 sm:$0xff]   ;;  %v5276_v52 = vld [vmem:[%s7226_s2 + $0x568] ss:$16 sps:$4 sm:$0xff]  }
  0x77   : > { %1785 = vmatpush1.bf16.msra.mxu0 %v5180_v53  ;;  %1957 = vmatpush1.bf16.msra.mxu1 %v5183_v54  ;;  %v5281_v53 = vld [vmem:[%s7226_s2 + $0x584] ss:$16 sps:$4 sm:$0xff]   ;;  %v5284_v54 = vld [vmem:[%s7226_s2 + $0x58c] ss:$16 sps:$4 sm:$0xff]  }
  0x78   : > { %1786 = vmatprep.subr.bf16.mxu0 %v5188_v55  ;;  %1958 = vmatprep.subr.bf16.mxu1 %v5191_v56  ;;  %v5279_v55 = vld [vmem:[%s7226_s2 + $0x580] ss:$16 sps:$4 sm:$0xff]   ;;  %v5282_v56 = vld [vmem:[%s7226_s2 + $0x588] ss:$16 sps:$4 sm:$0xff]  }
  0x7b   : > { %1787 = vmatpush1.bf16.msra.mxu0 %v5186_v57  ;;  %1959 = vmatpush1.bf16.msra.mxu1 %v5189_v58  ;;  %v5287_v57 = vld [vmem:[%s7226_s2 + $0x5a4] ss:$16 sps:$4 sm:$0xff]   ;;  %v5290_v58 = vld [vmem:[%s7226_s2 + $0x5ac] ss:$16 sps:$4 sm:$0xff]  }
  0x7c   : > { %1788 = vmatprep.subr.bf16.mxu0 %v5194_v59  ;;  %1960 = vmatprep.subr.bf16.mxu1 %v5197_v60  ;;  %v5285_v59 = vld [vmem:[%s7226_s2 + $0x5a0] ss:$16 sps:$4 sm:$0xff]   ;;  %v5288_v60 = vld [vmem:[%s7226_s2 + $0x5a8] ss:$16 sps:$4 sm:$0xff]  }
  0x7f   : > { %1789 = vmatpush1.bf16.msra.mxu0 %v5192_v61  ;;  %1961 = vmatpush1.bf16.msra.mxu1 %v5195_v62  ;;  %v5293_v61 = vld [vmem:[%s7226_s2 + $0x5c4] ss:$16 sps:$4 sm:$0xff]   ;;  %v5296_v62 = vld [vmem:[%s7226_s2 + $0x5cc] ss:$16 sps:$4 sm:$0xff]  }
  0x80   : > { %1790 = vmatprep.subr.bf16.mxu0 %v5200_v63  ;;  %1962 = vmatprep.subr.bf16.mxu1 %v5203_v0  ;;  %v5291_v63 = vld [vmem:[%s7226_s2 + $0x5c0] ss:$16 sps:$4 sm:$0xff]   ;;  %v5294_v0 = vld [vmem:[%s7226_s2 + $0x5c8] ss:$16 sps:$4 sm:$0xff]  }
  0x83   : > { %1791 = vmatpush1.bf16.msra.mxu0 %v5198_v1  ;;  %1963 = vmatpush1.bf16.msra.mxu1 %v5201_v2  ;;  %v5299_v1 = vld [vmem:[%s7226_s2 + $0x5e4] ss:$16 sps:$4 sm:$0xff]   ;;  %v5302_v2 = vld [vmem:[%s7226_s2 + $0x5ec] ss:$16 sps:$4 sm:$0xff]  }
  0x84   : > { %1803 = vmatprep.subr.bf16.mxu0 %v5209_v3  ;;  %1975 = vmatprep.subr.bf16.mxu1 %v5212_v4  ;;  %v5297_v3 = vld [vmem:[%s7226_s2 + $0x5e0] ss:$16 sps:$4 sm:$0xff]   ;;  %v5300_v4 = vld [vmem:[%s7226_s2 + $0x5e8] ss:$16 sps:$4 sm:$0xff]  }
  0x86   : > { %1793 = vmatmul.mubr.bf16.vlgmr.msra.gmra.mrb[0].mxu0 %v5204_v5  ;;  %1965 = vmatmul.mubr.bf16.vlgmr.msra.gmra.mrb[0].mxu1 %v5204_v5  ;;  %v5308_v5 = vld [vmem:[%s7226_s2 + $0x604] ss:$16 sps:$4 sm:$0xff]  }
  0x87   : > { %1804 = vmatpush1.bf16.msra.mxu0 %v5207_v6  ;;  %1976 = vmatpush1.bf16.msra.mxu1 %v5210_v7  ;;  %v5303_v6 = vld [vmem:[%s5935_s19 + $0x10] ss:$28 sps:$4 sm:$0xff]  }
  0x88   : > { %1805 = vmatprep.subr.bf16.mxu0 %v5215_v8  ;;  %1977 = vmatprep.subr.bf16.mxu1 %v5218_v9  ;;  %v5306_v7 = vld [vmem:[%s7226_s2 + $0x600] ss:$16 sps:$4 sm:$0xff]   ;;  %v5312_v8 = vld [vmem:[%s7226_s2 + $0x60c] ss:$16 sps:$4 sm:$0xff]   ;;  %v5716_v9 = vmov 0  }
  0x89   : > { %1835 = vmatprep.mubr.bf16.mxu0 %v5305_v12  ;;  %2007 = vmatprep.mubr.bf16.mxu1 %v5305_v12  ;;  %v5315_v12 = vld [vmem:[%s7228_s4 + $0x4] ss:$8 sps:$4 sm:$0xff]  }
  0x8b   : > { %1806 = vmatpush1.bf16.msra.mxu0 %v5213_v10  ;;  %1978 = vmatpush1.bf16.msra.mxu1 %v5216_v11  ;;  %v5309_v10 = vld [vmem:[%s5935_s19 + $0x18] ss:$28 sps:$4 sm:$0xff]  }
  0x8c   : > { %1807 = vmatprep.subr.bf16.mxu0 %v5221_v13  ;;  %1979 = vmatprep.subr.bf16.mxu1 %v5224_v14  ;;  %v5310_v11 = vld [vmem:[%s7226_s2 + $0x608] ss:$16 sps:$4 sm:$0xff]   ;;  %v5318_v14 = vld [vmem:[%s7228_s4 + $0x14] ss:$8 sps:$4 sm:$0xff]  }
  0x8d   : > { %v5313_v13 = vld [vmem:[%s7228_s4] ss:$8 sps:$4 sm:$0xff]  }
  0x8f   : > { %1808 = vmatpush1.bf16.msra.mxu0 %v5219_v15  ;;  %1980 = vmatpush1.bf16.msra.mxu1 %v5222_v16  ;;  %v5316_v15 = vld [vmem:[%s7228_s4 + $0x10] ss:$8 sps:$4 sm:$0xff]   ;;  %v5321_v16 = vld [vmem:[%s7228_s4 + $0x24] ss:$8 sps:$4 sm:$0xff]  }
  0x90   : > { %1809 = vmatprep.subr.bf16.mxu0 %v5227_v17  ;;  %1981 = vmatprep.subr.bf16.mxu1 %v5230_v18  ;;  %v5319_v17 = vld [vmem:[%s7228_s4 + $0x20] ss:$8 sps:$4 sm:$0xff]   ;;  %v5324_v18 = vld [vmem:[%s7228_s4 + $0x34] ss:$8 sps:$4 sm:$0xff]  }
  0x93   : > { %1810 = vmatpush1.bf16.msra.mxu0 %v5225_v19  ;;  %1982 = vmatpush1.bf16.msra.mxu1 %v5228_v20  ;;  %v5322_v19 = vld [vmem:[%s7228_s4 + $0x30] ss:$8 sps:$4 sm:$0xff]   ;;  %v5327_v20 = vld [vmem:[%s7228_s4 + $0x44] ss:$8 sps:$4 sm:$0xff]  }
  0x94   : > { %1811 = vmatprep.subr.bf16.mxu0 %v5233_v21  ;;  %1983 = vmatprep.subr.bf16.mxu1 %v5236_v22  ;;  %v5325_v21 = vld [vmem:[%s7228_s4 + $0x40] ss:$8 sps:$4 sm:$0xff]   ;;  %v5330_v22 = vld [vmem:[%s7228_s4 + $0x54] ss:$8 sps:$4 sm:$0xff]  }
  0x97   : > { %1812 = vmatpush1.bf16.msra.mxu0 %v5231_v23  ;;  %1984 = vmatpush1.bf16.msra.mxu1 %v5234_v24  ;;  %v5328_v23 = vld [vmem:[%s7228_s4 + $0x50] ss:$8 sps:$4 sm:$0xff]   ;;  %v5333_v24 = vld [vmem:[%s7228_s4 + $0x64] ss:$8 sps:$4 sm:$0xff]  }
  0x98   : > { %1813 = vmatprep.subr.bf16.mxu0 %v5239_v25  ;;  %1985 = vmatprep.subr.bf16.mxu1 %v5242_v26  ;;  %v5331_v25 = vld [vmem:[%s7228_s4 + $0x60] ss:$8 sps:$4 sm:$0xff]   ;;  %v5336_v26 = vld [vmem:[%s7228_s4 + $0x74] ss:$8 sps:$4 sm:$0xff]  }
  0x9b   : > { %1814 = vmatpush1.bf16.msra.mxu0 %v5237_v27  ;;  %1986 = vmatpush1.bf16.msra.mxu1 %v5240_v28  ;;  %v5334_v27 = vld [vmem:[%s7228_s4 + $0x70] ss:$8 sps:$4 sm:$0xff]   ;;  %v5339_v28 = vld [vmem:[%s7228_s4 + $0x84] ss:$8 sps:$4 sm:$0xff]  }
  0x9c   : > { %1815 = vmatprep.subr.bf16.mxu0 %v5245_v29  ;;  %1987 = vmatprep.subr.bf16.mxu1 %v5248_v30  ;;  %v5337_v29 = vld [vmem:[%s7228_s4 + $0x80] ss:$8 sps:$4 sm:$0xff]   ;;  %v5342_v30 = vld [vmem:[%s7228_s4 + $0x94] ss:$8 sps:$4 sm:$0xff]  }
  0x9f   : > { %1816 = vmatpush1.bf16.msra.mxu0 %v5243_v31  ;;  %1988 = vmatpush1.bf16.msra.mxu1 %v5246_v32  ;;  %v5340_v31 = vld [vmem:[%s7228_s4 + $0x90] ss:$8 sps:$4 sm:$0xff]   ;;  %v5345_v32 = vld [vmem:[%s7228_s4 + $0xa4] ss:$8 sps:$4 sm:$0xff]  }
  0xa0   : > { %1817 = vmatprep.subr.bf16.mxu0 %v5251_v33  ;;  %1989 = vmatprep.subr.bf16.mxu1 %v5254_v34  ;;  %v5343_v33 = vld [vmem:[%s7228_s4 + $0xa0] ss:$8 sps:$4 sm:$0xff]   ;;  %v5348_v34 = vld [vmem:[%s7228_s4 + $0xb4] ss:$8 sps:$4 sm:$0xff]  }
  0xa3   : > { %1818 = vmatpush1.bf16.msra.mxu0 %v5249_v35  ;;  %1990 = vmatpush1.bf16.msra.mxu1 %v5252_v36  ;;  %v5346_v35 = vld [vmem:[%s7228_s4 + $0xb0] ss:$8 sps:$4 sm:$0xff]   ;;  %v5349_v36 = vld [vmem:[%s7228_s4 + $0xc0] ss:$8 sps:$4 sm:$0xff]  }
  0xa4   : > { %1819 = vmatprep.subr.bf16.mxu0 %v5257_v37  ;;  %1991 = vmatprep.subr.bf16.mxu1 %v5260_v38  ;;  %v5351_v37 = vld [vmem:[%s7228_s4 + $0xc4] ss:$8 sps:$4 sm:$0xff]   ;;  %v5354_v38 = vld [vmem:[%s7228_s4 + $0xd4] ss:$8 sps:$4 sm:$0xff]  }
  0xa7   : > { %1820 = vmatpush1.bf16.msra.mxu0 %v5255_v39  ;;  %1992 = vmatpush1.bf16.msra.mxu1 %v5258_v40  ;;  %v5352_v39 = vld [vmem:[%s7228_s4 + $0xd0] ss:$8 sps:$4 sm:$0xff]   ;;  %v5357_v40 = vld [vmem:[%s7228_s4 + $0xe4] ss:$8 sps:$4 sm:$0xff]  }
  0xa8   : > { %1821 = vmatprep.subr.bf16.mxu0 %v5263_v41  ;;  %1993 = vmatprep.subr.bf16.mxu1 %v5266_v42  ;;  %v5355_v41 = vld [vmem:[%s7228_s4 + $0xe0] ss:$8 sps:$4 sm:$0xff]   ;;  %v5360_v42 = vld [vmem:[%s7228_s4 + $0xf4] ss:$8 sps:$4 sm:$0xff]  }
  0xab   : > { %1822 = vmatpush1.bf16.msra.mxu0 %v5261_v43  ;;  %1994 = vmatpush1.bf16.msra.mxu1 %v5264_v44  ;;  %v5358_v43 = vld [vmem:[%s7228_s4 + $0xf0] ss:$8 sps:$4 sm:$0xff]   ;;  %v5363_v44 = vld [vmem:[%s7228_s4 + $0x104] ss:$8 sps:$4 sm:$0xff]  }
  0xac   : > { %1823 = vmatprep.subr.bf16.mxu0 %v5269_v45  ;;  %1995 = vmatprep.subr.bf16.mxu1 %v5272_v46  ;;  %v678_v45 = vlaneseq }
  0xaf   : > { %1824 = vmatpush1.bf16.msra.mxu0 %v5267_v47  ;;  %1996 = vmatpush1.bf16.msra.mxu1 %v5270_v48 }
  0xb0   : > { %1825 = vmatprep.subr.bf16.mxu0 %v5275_v49  ;;  %1997 = vmatprep.subr.bf16.mxu1 %v5278_v50  ;;  %v6501_v49 = vshrl.u32 %v678_v45, 7  ;;  %v5385_v45 = vld [vmem:[%s7228_s4 + $0x180] ss:$8 sps:$4 sm:$0xff]  }
  0xb3   : > { %1826 = vmatpush1.bf16.msra.mxu0 %v5273_v51  ;;  %1998 = vmatpush1.bf16.msra.mxu1 %v5276_v52  ;;  %v6504_v51 = vsub.s32 0, %v6501_v49  ;;  %v6507_v52 = vsub.s32 1, %v6501_v49 }
  0xb4   : > { %1827 = vmatprep.subr.bf16.mxu0 %v5281_v53  ;;  %1999 = vmatprep.subr.bf16.mxu1 %v5284_v54  ;;  %v676_v53 = vld [vmem:[%s7227_s3] sm:$0xf] }
  0xb5   : > { %v681_v54 = vrot.slane %v676_v53, %v6504_v51 }
  0xb7   : > { %1828 = vmatpush1.bf16.msra.mxu0 %v5279_v55  ;;  %2000 = vmatpush1.bf16.msra.mxu1 %v5282_v56  ;;  %v685_v55 = vrot.slane %v676_v53, %v6507_v52  ;;  %v6515_v56 = vsub.s32 2, %v6501_v49 }
  0xb8   : > { %1829 = vmatprep.subr.bf16.mxu0 %v5287_v57  ;;  %2001 = vmatprep.subr.bf16.mxu1 %v5290_v58  ;;  %v6518_v57 = vsub.s32 3, %v6501_v49 }
  0xbb   : > { %1830 = vmatpush1.bf16.msra.mxu0 %v5285_v59  ;;  %2002 = vmatpush1.bf16.msra.mxu1 %v5288_v60 }
  0xbc   : > { %1831 = vmatprep.subr.bf16.mxu0 %v5293_v61  ;;  %2003 = vmatprep.subr.bf16.mxu1 %v5296_v62 }
  0xbf   : > { %1832 = vmatpush1.bf16.msra.mxu0 %v5291_v63  ;;  %2004 = vmatpush1.bf16.msra.mxu1 %v5294_v0  ;;  %v689_v63 = vrot.slane %v676_v53, %v6515_v56 }
  0xc0   : > { %1833 = vmatprep.subr.bf16.mxu0 %v5299_v1  ;;  %2005 = vmatprep.subr.bf16.mxu1 %v5302_v2  ;;  %v693_v2 = vrot.slane %v676_v53, %v6518_v57 }
  0xc3   : > { %1834 = vmatpush1.bf16.msra.mxu0 %v5297_v3  ;;  %2006 = vmatpush1.bf16.msra.mxu1 %v5300_v4 }
  0xc4   : > { %1846 = vmatprep.subr.bf16.mxu0 %v5308_v5 }
  0xc6   : > { %1836 = vmatmul.mubr.bf16.vlgmr.msra.gmra.mrb[0].mxu0 %v5303_v6  ;;  %2008 = vmatmul.mubr.bf16.vlgmr.msra.gmra.mrb[0].mxu1 %v5303_v6 }
  0xc7   : > { %1847 = vmatpush1.bf16.msra.mxu0 %v5306_v7  ;;  %1878 = vmatprep.mubr.bf16.mxu0 %v5716_v9 }
  0xc8   : > { %2018 = vmatprep.subr.bf16.mxu0 %v5312_v8  ;;  %2594 = vmatprep.mubr.bf16.mxu1 %v5716_v9 }
  0xd2   : > { %4637 = vmatmul.mubr.msk.bf16.vlgmr.msra.gmra.mrb[0].mxu0 %vm1713_vm0, %v5309_v10 }
  0xd3   : > { %2019 = vmatpush1.bf16.msra.mxu0 %v5310_v11  ;;  %2050 = vmatprep.mubr.bf16.mxu0 %v5716_v9 }
  0xd4   : > { %2388 = vmatprep.subr.bf16.mxu0 %v5315_v12 }
  0xda   : > { %4638 = vmatmul.mubr.msk.bf16.vlgmr.msra.gmra.mrb[4].mxu0 %vm1713_vm0, %v5309_v10 }
  0xdb   : > { %2389 = vmatpush1.bf16.msra.mxu0 %v5313_v13 }
  0xdc   : > { %2390 = vmatprep.subr.bf16.mxu0 %v5318_v14  ;;  %v5361_v14 = vld [vmem:[%s7228_s4 + $0x100] ss:$8 sps:$4 sm:$0xff]  }
  0xdf   : > { %2391 = vmatpush1.bf16.msra.mxu0 %v5316_v15 }
  0xe0   : > { %2392 = vmatprep.subr.bf16.mxu0 %v5321_v16 }
  0xe3   : > { %2393 = vmatpush1.bf16.msra.mxu0 %v5319_v17 }
  0xe4   : > { %2394 = vmatprep.subr.bf16.mxu0 %v5324_v18  ;;  %v5366_v18 = vld [vmem:[%s7228_s4 + $0x114] ss:$8 sps:$4 sm:$0xff]  }
  0xe7   : > { %2395 = vmatpush1.bf16.msra.mxu0 %v5322_v19 }
  0xe8   : > { %2396 = vmatprep.subr.bf16.mxu0 %v5327_v20 }
  0xeb   : > { %2397 = vmatpush1.bf16.msra.mxu0 %v5325_v21 }
  0xec   : > { %2398 = vmatprep.subr.bf16.mxu0 %v5330_v22 }
  0xef   : > { %2399 = vmatpush1.bf16.msra.mxu0 %v5328_v23 }
  0xf0   : > { %2400 = vmatprep.subr.bf16.mxu0 %v5333_v24 }
  0xf3   : > { %2401 = vmatpush1.bf16.msra.mxu0 %v5331_v25  ;;  %v5364_v25 = vld [vmem:[%s7228_s4 + $0x110] ss:$8 sps:$4 sm:$0xff]  }
  0xf4   : > { %2402 = vmatprep.subr.bf16.mxu0 %v5336_v26 }
  0xf7   : > { %2403 = vmatpush1.bf16.msra.mxu0 %v5334_v27 }
  0xf8   : > { %2404 = vmatprep.subr.bf16.mxu0 %v5339_v28  ;;  %v5369_v28 = vld [vmem:[%s7228_s4 + $0x124] ss:$8 sps:$4 sm:$0xff]  }
  0xfb   : > { %2405 = vmatpush1.bf16.msra.mxu0 %v5337_v29 }
  0xfc   : > { %2406 = vmatprep.subr.bf16.mxu0 %v5342_v30 }
  0xff   : > { %2407 = vmatpush1.bf16.msra.mxu0 %v5340_v31 }
 0x100   : > { %2408 = vmatprep.subr.bf16.mxu0 %v5345_v32 }
 0x103   : > { %2409 = vmatpush1.bf16.msra.mxu0 %v5343_v33  ;;  %v5367_v33 = vld [vmem:[%s7228_s4 + $0x120] ss:$8 sps:$4 sm:$0xff]  }
 0x104   : > { %2410 = vmatprep.subr.bf16.mxu0 %v5348_v34  ;;  %v5372_v34 = vld [vmem:[%s7228_s4 + $0x134] ss:$8 sps:$4 sm:$0xff]  }
 0x107   : > { %2411 = vmatpush1.bf16.msra.mxu0 %v5346_v35  ;;  %v5370_v35 = vld [vmem:[%s7228_s4 + $0x130] ss:$8 sps:$4 sm:$0xff]  }
 0x108   : > { %2412 = vmatprep.subr.bf16.mxu0 %v5351_v37  ;;  %v5373_v37 = vld [vmem:[%s7228_s4 + $0x140] ss:$8 sps:$4 sm:$0xff]  }
 0x10b   : > { %2413 = vmatpush1.bf16.msra.mxu0 %v5349_v36  ;;  %v5375_v36 = vld [vmem:[%s7228_s4 + $0x144] ss:$8 sps:$4 sm:$0xff]  }
 0x10c   : > { %2414 = vmatprep.subr.bf16.mxu0 %v5354_v38  ;;  %v5378_v38 = vld [vmem:[%s7228_s4 + $0x154] ss:$8 sps:$4 sm:$0xff]  }
 0x10f   : > { %2415 = vmatpush1.bf16.msra.mxu0 %v5352_v39  ;;  %v5376_v39 = vld [vmem:[%s7228_s4 + $0x150] ss:$8 sps:$4 sm:$0xff]  }
 0x110   : > { %2416 = vmatprep.subr.bf16.mxu0 %v5357_v40  ;;  %v5381_v40 = vld [vmem:[%s7228_s4 + $0x164] ss:$8 sps:$4 sm:$0xff]  }
 0x113   : > { %2417 = vmatpush1.bf16.msra.mxu0 %v5355_v41  ;;  %v5379_v41 = vld [vmem:[%s7228_s4 + $0x160] ss:$8 sps:$4 sm:$0xff]  }
 0x114   : > { %2418 = vmatprep.subr.bf16.mxu0 %v5360_v42  ;;  %v5384_v42 = vld [vmem:[%s7228_s4 + $0x174] ss:$8 sps:$4 sm:$0xff]  }
 0x117   : > { %2419 = vmatpush1.bf16.msra.mxu0 %v5358_v43  ;;  %v5382_v43 = vld [vmem:[%s7228_s4 + $0x170] ss:$8 sps:$4 sm:$0xff]  }
 0x118   : > { %2431 = vmatprep.subr.bf16.mxu0 %v5363_v44  ;;  %v5387_v44 = vld [vmem:[%s7228_s4 + $0x184] ss:$8 sps:$4 sm:$0xff]  }
 0x199   : > { %v2009_v46 = vpop.f32.mrb[0].mxu1 }
 0x19a   : > { %v2011_v47 = vpop.f32.mrb[1].mxu1  ;;  %v4939_v8 = vadd.f32 %v2009_v46, %v689_v63  ;;  %v5390_v46 = vld [vmem:[%s7230_s6 + $0x4] ss:$16 sps:$4 sm:$0xff]  }
 0x19b   : > { %v2013_v48 = vpop.f32.mrb[2].mxu1  ;;  %v4941_v11 = vadd.f32 %v2011_v47, %v693_v2  ;;  %v5388_v47 = vld [vmem:[%s7230_s6] ss:$16 sps:$4 sm:$0xff]   ;;  %2562 = vmatprep.subr.bf16.mxu1 %v5390_v46 }
 0x19c   : > { %v2015_v50 = vpop.f32.mrb[3].mxu1  ;;  %v4943_v15 = vadd.f32 %v2013_v48, %v689_v63  ;;  %2563 = vmatpush1.bf16.msra.mxu1 %v5388_v47  ;;  %v2491_v48 = vld [vmem:[%s7230_s6 + $0x20] sm:$0x33]  ;;  %v5413_v63 = vld [vmem:[%s7232_s8 + $0x78] ss:$28 sps:$4 sm:$0xff]  }
 0x19d   : > { %v4945_v19 = vadd.f32 %v2015_v50, %v693_v2  ;;  %v4695_v50 = vcombine.high %v2491_v48, %v2491_v48  ;;  %v4694_v53 = vcombine.low %v2491_v48, %v2491_v48  ;;  %v5427_v2 = vld [vmem:[%s7232_s8 + $0xec] ss:$28 sps:$4 sm:$0xff]  }
 0x19e   : > { %v5393_v47 = vld [vmem:[%s7230_s6 + $0x8] ss:$16 sps:$4 sm:$0xff]  }
 0x19f   : > { %4698 = vmatprep.subr.msk.bf16.mxu1 %vm2549_vm1, %v4695_v50 }
 0x1a5   : > { %v1880_v58 = vpop.f32.mrb[0].mxu0 }
 0x1a6   : > { %v4935_v59 = vadd.f32 %v1880_v58, %v681_v54  ;;  %v1882_v60 = vpop.f32.mrb[1].mxu0  ;;  %v5401_v58 = vld [vmem:[%s7232_s8 + $0x8] ss:$28 sps:$4 sm:$0xff]  }
 0x1a7   : > { %v4936_v61 = vadd.f32 %v1882_v60, %v685_v55  ;;  %v1884_v62 = vpop.f32.mrb[2].mxu0  ;;  %v5409_v60 = vld [vmem:[%s7232_s8 + $0x44] ss:$28 sps:$4 sm:$0xff]  }
 0x1a8   : > { %v4937_v0 = vadd.f32 %v1884_v62, %v681_v54  ;;  %v1886_v1 = vpop.f32.mrb[3].mxu0  ;;  %v2061_v4 = vmax.f32 %v4935_v59, 0.0  ;;  %v2551_v54 = vsel %vm2549_vm1, %v4694_v53, 0  ;;  %v5403_v59 = vld [vmem:[%s7232_s8 + $0xc] ss:$28 sps:$4 sm:$0xff]  }
 0x1a9   : > { %v4938_v3 = vadd.f32 %v1886_v1, %v685_v55  ;;  %v2062_v6 = vmax.f32 %v4936_v61, 0.0  ;;  %2565 = vmatpush1.bf16.msra.mxu1 %v2551_v54  ;;  %v5395_v55 = vld [vmem:[%s7230_s6 + $0xc] ss:$16 sps:$4 sm:$0xff]  }
 0x1aa   : > { %v2065_v5 = vmax.f32 %v4937_v0, 0.0  ;;  %2605 = vmatprep.subr.bf16.mxu1 %v5395_v55  ;;  %v5407_v61 = vld [vmem:[%s7232_s8 + $0x40] ss:$28 sps:$4 sm:$0xff]   ;;  %v5421_v0 = vld [vmem:[%s7232_s8 + $0xb4] ss:$28 sps:$4 sm:$0xff]  }
 0x1ab   : > { %v2066_v7 = vmax.f32 %v4938_v3, 0.0  ;;  %v5415_v62 = vld [vmem:[%s7232_s8 + $0x7c] ss:$28 sps:$4 sm:$0xff]   ;;  %v5419_v1 = vld [vmem:[%s7232_s8 + $0xb0] ss:$28 sps:$4 sm:$0xff]  }
 0x1ac   : > { %v2069_v10 = vpack.c.bf16 %v2065_v5, %v2061_v4  ;;  %v5425_v3 = vld [vmem:[%s7232_s8 + $0xe8] ss:$28 sps:$4 sm:$0xff]   ;;  %v5431_v5 = vld [vmem:[%s7232_s8 + $0x120] ss:$28 sps:$4 sm:$0xff]  }
 0x1ad   : > { %v2070_v12 = vpack.c.bf16 %v2066_v7, %v2062_v6  ;;  %v2052_v13 = vpop.f32.mrb[4].mxu0  ;;  %v5433_v4 = vld [vmem:[%s7232_s8 + $0x124] ss:$28 sps:$4 sm:$0xff]   ;;  %v5439_v6 = vld [vmem:[%s7232_s8 + $0x15c] ss:$28 sps:$4 sm:$0xff]  }
 0x1ae   : > { %v4940_v16 = vadd.f32 %v4939_v8, %v2052_v13  ;;  %v2054_v17 = vpop.f32.mrb[5].mxu0  ;;  %v5437_v7 = vld [vmem:[%s7232_s8 + $0x158] ss:$28 sps:$4 sm:$0xff]   ;;  %v5457_v13 = vld [vmem:[%s7232_s8 + $0x204] ss:$28 sps:$4 sm:$0xff]  }
 0x1af   : > { %v4942_v20 = vadd.f32 %v4941_v11, %v2054_v17  ;;  %v2056_v21 = vpop.f32.mrb[6].mxu0  ;;  %2420 = vmatprep.mubr.bf16.mxu0 %v2070_v12  ;;  %v5445_v8 = vld [vmem:[%s7232_s8 + $0x194] ss:$28 sps:$4 sm:$0xff]   ;;  %v5451_v11 = vld [vmem:[%s7232_s8 + $0x1cc] ss:$28 sps:$4 sm:$0xff]  }
 0x1b0   : > { %v4944_v22 = vadd.f32 %v4943_v15, %v2056_v21  ;;  %v2058_v23 = vpop.f32.mrb[7].mxu0  ;;  %2421 = vmatmul.mubr.bf16.vlgmr.msra.gmra.mrb[8].mxu0 %v2069_v10  ;;  %v2063_v26 = vmax.f32 %v4940_v16, 0.0  ;;  %v5443_v10 = vld [vmem:[%s7232_s8 + $0x190] ss:$28 sps:$4 sm:$0xff]   ;;  %v5449_v12 = vld [vmem:[%s7232_s8 + $0x1c8] ss:$28 sps:$4 sm:$0xff]  }
 0x1b1   : > { %v4946_v24 = vadd.f32 %v4945_v19, %v2058_v23  ;;  %2432 = vmatpush1.bf16.msra.mxu0 %v5361_v14  ;;  %v2064_v29 = vmax.f32 %v4942_v20, 0.0  ;;  %v5455_v14 = vld [vmem:[%s7232_s8 + $0x200] ss:$28 sps:$4 sm:$0xff]   ;;  %v5461_v16 = vld [vmem:[%s7232_s8 + $0x238] ss:$28 sps:$4 sm:$0xff]  }
 0x1b2   : > { %v2067_v27 = vmax.f32 %v4944_v22, 0.0  ;;  %2433 = vmatprep.subr.bf16.mxu0 %v5366_v18  ;;  %v5463_v15 = vld [vmem:[%s7232_s8 + $0x23c] ss:$28 sps:$4 sm:$0xff]   ;;  %v5469_v17 = vld [vmem:[%s7232_s8 + $0x274] ss:$28 sps:$4 sm:$0xff]  }
 0x1b3   : > { %v2068_v30 = vmax.f32 %v4946_v24, 0.0  ;;  %v5467_v18 = vld [vmem:[%s7232_s8 + $0x270] ss:$28 sps:$4 sm:$0xff]   ;;  %v5473_v20 = vld [vmem:[%s7232_s8 + $0x2a8] ss:$28 sps:$4 sm:$0xff]  }
 0x1b4   : > { %v2071_v31 = vpack.c.bf16 %v2067_v27, %v2063_v26  ;;  %v5475_v19 = vld [vmem:[%s7232_s8 + $0x2ac] ss:$28 sps:$4 sm:$0xff]   ;;  %v5481_v21 = vld [vmem:[%s7232_s8 + $0x2e4] ss:$28 sps:$4 sm:$0xff]  }
 0x1b5   : > { %v2072_v32 = vpack.c.bf16 %v2068_v30, %v2064_v29  ;;  %2434 = vmatpush1.bf16.msra.mxu0 %v5364_v25  ;;  %v5479_v22 = vld [vmem:[%s7232_s8 + $0x2e0] ss:$28 sps:$4 sm:$0xff]  }
 0x1b6   : > { %2435 = vmatprep.subr.bf16.mxu0 %v5369_v28  ;;  %v2123_v23 = vld [vmem:[%s7229_s5] sm:$0x3] }
 0x1b7   : > { %4689 = vmatprep.mubr.msk.bf16.mxu0 %vm1713_vm0, %v2072_v32  ;;  %v2128_v24 = vrot.slane %v2123_v23, %v6504_v51  ;;  %v2132_v25 = vrot.slane %v2123_v23, %v6507_v52  ;;  %v5400_v55 = vld [vmem:[%s7232_s8 + $0x4] ss:$28 sps:$4 sm:$0xff]   ;;  %v5487_v23 = vld [vmem:[%s7232_s8 + $0x31c] ss:$28 sps:$4 sm:$0xff]  }
 0x1b9   : > { %2436 = vmatpush1.bf16.msra.mxu0 %v5367_v33 }
 0x1ba   : > { %2437 = vmatprep.subr.bf16.mxu0 %v5372_v34 }
 0x1bd   : > { %2438 = vmatpush1.bf16.msra.mxu0 %v5370_v35 }
 0x1be   : > { %2439 = vmatprep.subr.bf16.mxu0 %v5375_v36 }
 0x1c1   : > { %2440 = vmatpush1.bf16.msra.mxu0 %v5373_v37 }
 0x1c2   : > { %2441 = vmatprep.subr.bf16.mxu0 %v5378_v38  ;;  %v2474_v38 = vld [vmem:[%s450_s22] sm:$0xff] }
 0x1c5   : > { %2442 = vmatpush1.bf16.msra.mxu0 %v5376_v39 }
 0x1c6   : > { %2443 = vmatprep.subr.bf16.mxu0 %v5381_v40  ;;  %v2475_v40 = vld [vmem:[%s450_s22 + $0x8] sm:$0xff] }
 0x1c9   : > { %2444 = vmatpush1.bf16.msra.mxu0 %v5379_v41 }
 0x1ca   : > { %2445 = vmatprep.subr.bf16.mxu0 %v5384_v42 }
 0x1cd   : > { %2446 = vmatpush1.bf16.msra.mxu0 %v5382_v43 }
 0x1ce   : > { %2447 = vmatprep.subr.bf16.mxu0 %v5387_v44 }
 0x1d1   : > { %2448 = vmatpush1.bf16.msra.mxu0 %v5385_v45  ;;  %v2492_v45 = vld [vmem:[%s7230_s6 + $0x28] sm:$0x33] }
 0x1d2   : > { %3886 = vmatprep.subr.bf16.mxu0 %v5403_v59  ;;  %v4697_v50 = vcombine.high %v2492_v45, %v2492_v45  ;;  %v4696_v53 = vcombine.low %v2492_v45, %v2492_v45  ;;  %v5406_v59 = vld [vmem:[%s7232_s8 + $0x3c] ss:$28 sps:$4 sm:$0xff]  }
 0x1d4   : > { %2464 = vmatmul.mubr.bf16.vlgmr.msra.gmra.mrb[8].mxu0 %v2071_v31  ;;  %v2557_v54 = vsel %vm2549_vm1, %v4696_v53, 0 }
 0x1d5   : > { %3887 = vmatpush1.bf16.msra.mxu0 %v5401_v58  ;;  %v5398_v58 = vld [vmem:[%s7232_s8] ss:$28 sps:$4 sm:$0xff]  }
 0x1d6   : > { %3888 = vmatprep.subr.bf16.mxu0 %v5409_v60  ;;  %v5404_v60 = vld [vmem:[%s7232_s8 + $0x38] ss:$28 sps:$4 sm:$0xff]  }
 0x1d9   : > { %3889 = vmatpush1.bf16.msra.mxu0 %v5407_v61  ;;  %v5412_v61 = vld [vmem:[%s7232_s8 + $0x74] ss:$28 sps:$4 sm:$0xff]  }
 0x1da   : > { %3890 = vmatprep.subr.bf16.mxu0 %v5415_v62  ;;  %v5410_v62 = vld [vmem:[%s7232_s8 + $0x70] ss:$28 sps:$4 sm:$0xff]  }
 0x1dd   : > { %3891 = vmatpush1.bf16.msra.mxu0 %v5413_v63  ;;  %v5418_v63 = vld [vmem:[%s7232_s8 + $0xac] ss:$28 sps:$4 sm:$0xff]  }
 0x1de   : > { %3892 = vmatprep.subr.bf16.mxu0 %v5421_v0  ;;  %v5416_v0 = vld [vmem:[%s7232_s8 + $0xa8] ss:$28 sps:$4 sm:$0xff]  }
 0x1e1   : > { %3893 = vmatpush1.bf16.msra.mxu0 %v5419_v1  ;;  %v5424_v1 = vld [vmem:[%s7232_s8 + $0xe4] ss:$28 sps:$4 sm:$0xff]  }
 0x1e2   : > { %3894 = vmatprep.subr.bf16.mxu0 %v5427_v2  ;;  %v5422_v2 = vld [vmem:[%s7232_s8 + $0xe0] ss:$28 sps:$4 sm:$0xff]  }
 0x1e5   : > { %3895 = vmatpush1.bf16.msra.mxu0 %v5425_v3  ;;  %v5430_v3 = vld [vmem:[%s7232_s8 + $0x11c] ss:$28 sps:$4 sm:$0xff]  }
 0x1e6   : > { %3896 = vmatprep.subr.bf16.mxu0 %v5433_v4  ;;  %v5428_v4 = vld [vmem:[%s7232_s8 + $0x118] ss:$28 sps:$4 sm:$0xff]  }
 0x1e9   : > { %3897 = vmatpush1.bf16.msra.mxu0 %v5431_v5  ;;  %v5436_v5 = vld [vmem:[%s7232_s8 + $0x154] ss:$28 sps:$4 sm:$0xff]  }
 0x1ea   : > { %3898 = vmatprep.subr.bf16.mxu0 %v5439_v6  ;;  %v5434_v6 = vld [vmem:[%s7232_s8 + $0x150] ss:$28 sps:$4 sm:$0xff]  }
 0x1ed   : > { %3899 = vmatpush1.bf16.msra.mxu0 %v5437_v7  ;;  %v5442_v7 = vld [vmem:[%s7232_s8 + $0x18c] ss:$28 sps:$4 sm:$0xff]  }
 0x1ee   : > { %3900 = vmatprep.subr.bf16.mxu0 %v5445_v8  ;;  %v5440_v8 = vld [vmem:[%s7232_s8 + $0x188] ss:$28 sps:$4 sm:$0xff]  }
 0x1f1   : > { %3901 = vmatpush1.bf16.msra.mxu0 %v5443_v10  ;;  %v5448_v10 = vld [vmem:[%s7232_s8 + $0x1c4] ss:$28 sps:$4 sm:$0xff]  }
 0x1f2   : > { %3902 = vmatprep.subr.bf16.mxu0 %v5451_v11  ;;  %v5446_v11 = vld [vmem:[%s7232_s8 + $0x1c0] ss:$28 sps:$4 sm:$0xff]  }
 0x1f5   : > { %3903 = vmatpush1.bf16.msra.mxu0 %v5449_v12  ;;  %v5454_v12 = vld [vmem:[%s7232_s8 + $0x1fc] ss:$28 sps:$4 sm:$0xff]  }
 0x1f6   : > { %3904 = vmatprep.subr.bf16.mxu0 %v5457_v13  ;;  %v5452_v13 = vld [vmem:[%s7232_s8 + $0x1f8] ss:$28 sps:$4 sm:$0xff]  }
 0x1f9   : > { %3905 = vmatpush1.bf16.msra.mxu0 %v5455_v14  ;;  %v5460_v14 = vld [vmem:[%s7232_s8 + $0x234] ss:$28 sps:$4 sm:$0xff]  }
 0x1fa   : > { %3906 = vmatprep.subr.bf16.mxu0 %v5463_v15  ;;  %v5458_v15 = vld [vmem:[%s7232_s8 + $0x230] ss:$28 sps:$4 sm:$0xff]  }
 0x1fd   : > { %3907 = vmatpush1.bf16.msra.mxu0 %v5461_v16  ;;  %v5466_v16 = vld [vmem:[%s7232_s8 + $0x26c] ss:$28 sps:$4 sm:$0xff]  }
 0x1fe   : > { %3908 = vmatprep.subr.bf16.mxu0 %v5469_v17  ;;  %v5464_v17 = vld [vmem:[%s7232_s8 + $0x268] ss:$28 sps:$4 sm:$0xff]  }
 0x201   : > { %3909 = vmatpush1.bf16.msra.mxu0 %v5467_v18  ;;  %v5472_v18 = vld [vmem:[%s7232_s8 + $0x2a4] ss:$28 sps:$4 sm:$0xff]  }
 0x202   : > { %3910 = vmatprep.subr.bf16.mxu0 %v5475_v19  ;;  %v5470_v19 = vld [vmem:[%s7232_s8 + $0x2a0] ss:$28 sps:$4 sm:$0xff]  }
 0x205   : > { %3911 = vmatpush1.bf16.msra.mxu0 %v5473_v20  ;;  %v5478_v20 = vld [vmem:[%s7232_s8 + $0x2dc] ss:$28 sps:$4 sm:$0xff]  }
 0x206   : > { %3912 = vmatprep.subr.bf16.mxu0 %v5481_v21  ;;  %v5476_v21 = vld [vmem:[%s7232_s8 + $0x2d8] ss:$28 sps:$4 sm:$0xff]  }
 0x209   : > { %3913 = vmatpush1.bf16.msra.mxu0 %v5479_v22  ;;  %v5484_v22 = vld [vmem:[%s7232_s8 + $0x314] ss:$28 sps:$4 sm:$0xff]  }
 0x20a   : > { %3914 = vmatprep.subr.bf16.mxu0 %v5487_v23  ;;  %v5518_v23 = vld [vmem:[%s7232_s8 + $0x460] ss:$28 sps:$4 sm:$0xff]  }
 0x2a7   : > { %v2465_v26 = vpop.f32.mrb[8].mxu0 }
 0x2a8   : > { %v4947_v27 = vadd.f32 %v2465_v26, %v2128_v24  ;;  %v2467_v28 = vpop.f32.mrb[9].mxu0  ;;  %v5490_v26 = vld [vmem:[%s7232_s8 + $0x34c] ss:$28 sps:$4 sm:$0xff]  }
 0x2a9   : > { %v4948_v29 = vadd.f32 %v2467_v28, %v2132_v25  ;;  %v2469_v30 = vpop.f32.mrb[10].mxu0  ;;  %v5488_v28 = vld [vmem:[%s7232_s8 + $0x348] ss:$28 sps:$4 sm:$0xff]  }
 0x2aa   : > { %4277 = vst.msk [vmem:[%s463_s18] sm:$0xff] %vm2545_vm2, %v4947_v27  ;;  %v4949_v31 = vadd.f32 %v2469_v30, %v2128_v24  ;;  %v2471_v32 = vpop.f32.mrb[11].mxu0  ;;  %v5482_v24 = vld [vmem:[%s7232_s8 + $0x310] ss:$28 sps:$4 sm:$0xff]   ;;  %v5496_v30 = vld [vmem:[%s7232_s8 + $0x384] ss:$28 sps:$4 sm:$0xff]  }
 0x2ab   : > { %v2476_v33 = vmul.f32 0.5, %v4948_v29  ;;  %4279 = vst.msk [vmem:[%s469_s24] sm:$0xff] %vm2545_vm2, %v4948_v29  ;;  %v4950_v34 = vadd.f32 %v2471_v32, %v2132_v25  ;;  %v5485_v25 = vld [vmem:[%s7232_s8 + $0x318] ss:$28 sps:$4 sm:$0xff]   ;;  %v5491_v29 = vld [vmem:[%s7232_s8 + $0x350] ss:$28 sps:$4 sm:$0xff]  }
 0x2ac   : > { %4278 = vst.msk [vmem:[%s463_s18 + $0x8] sm:$0xff] %vm2545_vm2, %v4949_v31  ;;  %3915 = vmatpush1.bf16.msra.mxu0 %v5485_v25  ;;  %v2493_v32 = vld [vmem:[%s7231_s7] sm:$0xf]  ;;  %v5526_v25 = vld [vmem:[%s7232_s8 + $0x49c] ss:$28 sps:$4 sm:$0xff]  }
 0x2ad   : > { %v2478_v35 = vmul.f32 1.442695, %v2476_v33  ;;  %v2477_v36 = vmul.f32 0.5, %v4950_v34  ;;  %4280 = vst.msk [vmem:[%s469_s24 + $0x8] sm:$0xff] %vm2545_vm2, %v4950_v34  ;;  %v2498_v33 = vrot.slane %v2493_v32, %v6504_v51  ;;  %v2502_v34 = vrot.slane %v2493_v32, %v6507_v52 }
 0x2ae   : > { %v2506_v45 = vrot.slane %v2493_v32, %v6515_v56 }
 0x2af   : > { %5648 = vpow2.f32 %v2478_v35  ;;  %v2480_v37 = vmul.f32 1.442695, %v2477_v36 }
 0x2b1   : > { %5650 = vpow2.f32 %v2480_v37 }
 0x2b9   : > { %v5649_v39 = vpop.eup %5648 }
 0x2ba   : > { %v2482_v41 = vmul.f32 %v5649_v39, %v2474_v38 }
 0x2bb   : > { %v5651_v42 = vpop.eup %5650 }
 0x2bc   : > { %v2483_v43 = vmul.f32 %v5651_v42, %v2475_v40  ;;  %v2484_v44 = vadd.f32 %v4947_v27, %v2482_v41  ;;  %v5493_v27 = vld [vmem:[%s7232_s8 + $0x354] ss:$28 sps:$4 sm:$0xff]  }
 0x2bd   : > { %3916 = vmatprep.subr.bf16.mxu0 %v5493_v27  ;;  %v5524_v27 = vld [vmem:[%s7232_s8 + $0x498] ss:$28 sps:$4 sm:$0xff]  }
 0x2be   : > { %v2485_v46 = vadd.f32 %v4949_v31, %v2483_v43  ;;  %3917 = vmatpush1.bf16.msra.mxu0 %v5491_v29  ;;  %v5499_v31 = vld [vmem:[%s7232_s8 + $0x38c] ss:$28 sps:$4 sm:$0xff]   ;;  %v5532_v29 = vld [vmem:[%s7232_s8 + $0x4d4] ss:$28 sps:$4 sm:$0xff]  }
 0x2bf   : > { %3929 = vmatprep.subr.bf16.mxu0 %v5499_v31  ;;  %v5530_v31 = vld [vmem:[%s7232_s8 + $0x4d0] ss:$28 sps:$4 sm:$0xff]  }
 0x2c0   : > { %v2486_v48 = vpack.c.bf16 %v2485_v46, %v2484_v44 }
 0x2c2   : > { %4699 = vmatmul.mubr.msk.bf16.vlgmr.msra.gmra.mrb[4].mxu1 %vm2545_vm2, %v2486_v48 }
 0x2c3   : > { %2606 = vmatpush1.bf16.msra.mxu1 %v5393_v47  ;;  %2637 = vmatprep.mubr.bf16.mxu1 %v5716_v9 }
 0x2c4   : > { %4700 = vmatprep.subr.msk.bf16.mxu1 %vm2549_vm1, %v4697_v50 }
 0x2c7   : > { %2608 = vmatpush1.bf16.msra.mxu1 %v2557_v54 }
 0x2c8   : > { %3800 = vmatprep.subr.bf16.mxu1 %v5400_v55  ;;  %v5494_v55 = vld [vmem:[%s7232_s8 + $0x380] ss:$28 sps:$4 sm:$0xff]  }
 0x2ca   : > { %4701 = vmatmul.mubr.msk.bf16.vlgmr.msra.gmra.mrb[8].mxu1 %vm2545_vm2, %v2486_v48  ;;  %v2510_v48 = vrot.slane %v2493_v32, %v6518_v57  ;;  %v5533_v32 = vld [vmem:[%s7232_s8 + $0x4d8] ss:$28 sps:$4 sm:$0xff]  }
 0x2cb   : > { %3801 = vmatpush1.bf16.msra.mxu1 %v5398_v58  ;;  %v5497_v58 = vld [vmem:[%s7232_s8 + $0x388] ss:$28 sps:$4 sm:$0xff]  }
 0x2cc   : > { %3802 = vmatprep.subr.bf16.mxu1 %v5406_v59 }
 0x2cf   : > { %3803 = vmatpush1.bf16.msra.mxu1 %v5404_v60 }
 0x2d0   : > { %3804 = vmatprep.subr.bf16.mxu1 %v5412_v61  ;;  %v5502_v61 = vld [vmem:[%s7232_s8 + $0x3bc] ss:$28 sps:$4 sm:$0xff]  }
 0x2d3   : > { %3805 = vmatpush1.bf16.msra.mxu1 %v5410_v62  ;;  %v5505_v62 = vld [vmem:[%s7232_s8 + $0x3c4] ss:$28 sps:$4 sm:$0xff]  }
 0x2d4   : > { %3806 = vmatprep.subr.bf16.mxu1 %v5418_v63 }
 0x2d7   : > { %3807 = vmatpush1.bf16.msra.mxu1 %v5416_v0 }
 0x2d8   : > { %3808 = vmatprep.subr.bf16.mxu1 %v5424_v1 }
 0x2db   : > { %3809 = vmatpush1.bf16.msra.mxu1 %v5422_v2 }
 0x2dc   : > { %3810 = vmatprep.subr.bf16.mxu1 %v5430_v3 }
 0x2df   : > { %3811 = vmatpush1.bf16.msra.mxu1 %v5428_v4  ;;  %v5500_v4 = vld [vmem:[%s7232_s8 + $0x3b8] ss:$28 sps:$4 sm:$0xff]  }
 0x2e0   : > { %3812 = vmatprep.subr.bf16.mxu1 %v5436_v5  ;;  %v5503_v5 = vld [vmem:[%s7232_s8 + $0x3c0] ss:$28 sps:$4 sm:$0xff]  }
 0x2e3   : > { %3813 = vmatpush1.bf16.msra.mxu1 %v5434_v6 }
 0x2e4   : > { %3814 = vmatprep.subr.bf16.mxu1 %v5442_v7 }
 0x2e7   : > { %3815 = vmatpush1.bf16.msra.mxu1 %v5440_v8  ;;  %v5508_v8 = vld [vmem:[%s7232_s8 + $0x3f4] ss:$28 sps:$4 sm:$0xff]  }
 0x2e8   : > { %3816 = vmatprep.subr.bf16.mxu1 %v5448_v10  ;;  %v5511_v10 = vld [vmem:[%s7232_s8 + $0x3fc] ss:$28 sps:$4 sm:$0xff]  }
 0x2eb   : > { %3817 = vmatpush1.bf16.msra.mxu1 %v5446_v11 }
 0x2ec   : > { %3818 = vmatprep.subr.bf16.mxu1 %v5454_v12 }
 0x2ef   : > { %3819 = vmatpush1.bf16.msra.mxu1 %v5452_v13 }
 0x2f0   : > { %3820 = vmatprep.subr.bf16.mxu1 %v5460_v14 }
 0x2f3   : > { %3821 = vmatpush1.bf16.msra.mxu1 %v5458_v15  ;;  %v5506_v15 = vld [vmem:[%s7232_s8 + $0x3f0] ss:$28 sps:$4 sm:$0xff]  }
 0x2f4   : > { %3822 = vmatprep.subr.bf16.mxu1 %v5466_v16  ;;  %v5509_v16 = vld [vmem:[%s7232_s8 + $0x3f8] ss:$28 sps:$4 sm:$0xff]  }
 0x2f7   : > { %3823 = vmatpush1.bf16.msra.mxu1 %v5464_v17  ;;  %v5514_v17 = vld [vmem:[%s7232_s8 + $0x42c] ss:$28 sps:$4 sm:$0xff]  }
 0x2f8   : > { %3824 = vmatprep.subr.bf16.mxu1 %v5472_v18  ;;  %v5517_v18 = vld [vmem:[%s7232_s8 + $0x434] ss:$28 sps:$4 sm:$0xff]  }
 0x2fb   : > { %3825 = vmatpush1.bf16.msra.mxu1 %v5470_v19  ;;  %v5512_v19 = vld [vmem:[%s7232_s8 + $0x428] ss:$28 sps:$4 sm:$0xff]  }
 0x2fc   : > { %3826 = vmatprep.subr.bf16.mxu1 %v5478_v20  ;;  %v5515_v20 = vld [vmem:[%s7232_s8 + $0x430] ss:$28 sps:$4 sm:$0xff]  }
 0x2ff   : > { %3827 = vmatpush1.bf16.msra.mxu1 %v5476_v21  ;;  %v5520_v21 = vld [vmem:[%s7232_s8 + $0x464] ss:$28 sps:$4 sm:$0xff]  }
 0x300   : > { %3828 = vmatprep.subr.bf16.mxu1 %v5484_v22  ;;  %v5523_v22 = vld [vmem:[%s7232_s8 + $0x46c] ss:$28 sps:$4 sm:$0xff]  }
 0x303   : > { %3829 = vmatpush1.bf16.msra.mxu1 %v5482_v24  ;;  %v5521_v24 = vld [vmem:[%s7232_s8 + $0x468] ss:$28 sps:$4 sm:$0xff]  }
 0x304   : > { %3830 = vmatprep.subr.bf16.mxu1 %v5490_v26  ;;  %v5529_v26 = vld [vmem:[%s7232_s8 + $0x4a4] ss:$28 sps:$4 sm:$0xff]  }
 0x307   : > { %3831 = vmatpush1.bf16.msra.mxu1 %v5488_v28  ;;  %v5527_v28 = vld [vmem:[%s7232_s8 + $0x4a0] ss:$28 sps:$4 sm:$0xff]  }
 0x308   : > { %3843 = vmatprep.subr.bf16.mxu1 %v5496_v30  ;;  %v5535_v30 = vld [vmem:[%s7232_s8 + $0x4dc] ss:$28 sps:$4 sm:$0xff]  }
 0x395   : > { %v2596_v35 = vpop.f32.mrb[4].mxu1 }
 0x396   : > { %v2597_v36 = vadd.f32 %v2596_v35, %v2498_v33  ;;  %v2598_v37 = vpop.f32.mrb[5].mxu1  ;;  %v5536_v35 = vld [vmem:[%s7232_s8 + $0x508] ss:$28 sps:$4 sm:$0xff]  }
 0x397   : > { %v2599_v38 = vadd.f32 %v2598_v37, %v2502_v34  ;;  %v2600_v39 = vpop.f32.mrb[6].mxu1  ;;  %v5544_v37 = vld [vmem:[%s7232_s8 + $0x544] ss:$28 sps:$4 sm:$0xff]  }
 0x398   : > { %v2601_v40 = vadd.f32 %v2600_v39, %v2498_v33  ;;  %v2602_v41 = vpop.f32.mrb[7].mxu1  ;;  %v2648_v43 = vmax.f32 %v2597_v36, 0.0  ;;  %v5538_v33 = vld [vmem:[%s7232_s8 + $0x50c] ss:$28 sps:$4 sm:$0xff]   ;;  %v5542_v39 = vld [vmem:[%s7232_s8 + $0x540] ss:$28 sps:$4 sm:$0xff]  }
 0x399   : > { %v2603_v42 = vadd.f32 %v2602_v41, %v2502_v34  ;;  %v2649_v46 = vmax.f32 %v2599_v38, 0.0  ;;  %v5541_v34 = vld [vmem:[%s7232_s8 + $0x514] ss:$28 sps:$4 sm:$0xff]   ;;  %v5547_v38 = vld [vmem:[%s7232_s8 + $0x54c] ss:$28 sps:$4 sm:$0xff]  }
 0x39a   : > { %v2652_v44 = vmax.f32 %v2601_v40, 0.0  ;;  %v5539_v36 = vld [vmem:[%s7232_s8 + $0x510] ss:$28 sps:$4 sm:$0xff]   ;;  %v5545_v40 = vld [vmem:[%s7232_s8 + $0x548] ss:$28 sps:$4 sm:$0xff]  }
 0x39b   : > { %v2653_v47 = vmax.f32 %v2603_v42, 0.0  ;;  %v5550_v41 = vld [vmem:[%s7232_s8 + $0x14] ss:$28 sps:$4 sm:$0xff]  }
 0x39c   : > { %v6823_v50 = vpack.c.bf16 %v2652_v44, %v2648_v43  ;;  %v5551_v42 = vld [vmem:[%s7232_s8 + $0x1d8] ss:$28 sps:$4 sm:$0xff]   ;;  %v5548_v43 = vld [vmem:[%s7232_s8 + $0x10] ss:$28 sps:$4 sm:$0xff]  }
 0x39d   : > { %v6825_v53 = vpack.c.bf16 %v2653_v47, %v2649_v46  ;;  %v2639_v54 = vpop.f32.mrb[8].mxu1  ;;  %v5552_v44 = vld [vmem:[%s7232_s8 + $0x18] ss:$28 sps:$4 sm:$0xff]   ;;  %v5556_v46 = vld [vmem:[%s7232_s8 + $0x210] ss:$28 sps:$4 sm:$0xff]  }
 0x39e   : > { %v2640_v59 = vadd.f32 %v2639_v54, %v2506_v45  ;;  %v2641_v60 = vpop.f32.mrb[9].mxu1  ;;  %v5553_v47 = vld [vmem:[%s7232_s8 + $0x48] ss:$28 sps:$4 sm:$0xff]  }
 0x39f   : > { %v2642_v63 = vadd.f32 %v2641_v60, %v2510_v48  ;;  %v2643_v0 = vpop.f32.mrb[10].mxu1  ;;  %3832 = vmatprep.mubr.bf16.mxu1 %v6825_v53  ;;  %3918 = vmatprep.mubr.bf16.mxu0 %v6825_v53  ;;  %v5560_v54 = vld [vmem:[%s7232_s8 + $0x84] ss:$28 sps:$4 sm:$0xff]  }
 0x3a0   : > { %v2644_v1 = vadd.f32 %v2643_v0, %v2506_v45  ;;  %v2645_v2 = vpop.f32.mrb[11].mxu1  ;;  %3833 = vmatmul.mubr.bf16.vlgmr.msra.gmra.mrb[12].mxu1 %v6823_v50  ;;  %3919 = vmatmul.mubr.bf16.vlgmr.msra.gmra.mrb[12].mxu0 %v6823_v50  ;;  %v2650_v6 = vmax.f32 %v2640_v59, 0.0  ;;  %v5555_v45 = vld [vmem:[%s7232_s8 + $0x4c] ss:$28 sps:$4 sm:$0xff]   ;;  %v5565_v59 = vld [vmem:[%s7232_s8 + $0xbc] ss:$28 sps:$4 sm:$0xff]  }
 0x3a1   : > { %v2646_v3 = vadd.f32 %v2645_v2, %v2510_v48  ;;  %3844 = vmatpush1.bf16.msra.mxu1 %v5494_v55  ;;  %3930 = vmatpush1.bf16.msra.mxu0 %v5497_v58  ;;  %v2651_v11 = vmax.f32 %v2642_v63, 0.0  ;;  %v5557_v48 = vld [vmem:[%s7232_s8 + $0x50] ss:$28 sps:$4 sm:$0xff]   ;;  %v5561_v55 = vld [vmem:[%s7232_s8 + $0x248] ss:$28 sps:$4 sm:$0xff]  }
 0x3a2   : > { %v2654_v7 = vmax.f32 %v2644_v1, 0.0  ;;  %3845 = vmatprep.subr.bf16.mxu1 %v5502_v61  ;;  %3931 = vmatprep.subr.bf16.mxu0 %v5505_v62  ;;  %v5558_v58 = vld [vmem:[%s7232_s8 + $0x80] ss:$28 sps:$4 sm:$0xff]   ;;  %v5563_v61 = vld [vmem:[%s7232_s8 + $0xb8] ss:$28 sps:$4 sm:$0xff]  }
 0x3a3   : > { %v2655_v12 = vmax.f32 %v2646_v3, 0.0  ;;  %v5566_v60 = vld [vmem:[%s7232_s8 + $0x280] ss:$28 sps:$4 sm:$0xff]   ;;  %v5570_v63 = vld [vmem:[%s7232_s8 + $0xf4] ss:$28 sps:$4 sm:$0xff]  }
 0x3a4   : > { %v6855_v13 = vpack.c.bf16 %v2654_v7, %v2650_v6  ;;  %v5567_v62 = vld [vmem:[%s7232_s8 + $0xc0] ss:$28 sps:$4 sm:$0xff]   ;;  %v5571_v0 = vld [vmem:[%s7232_s8 + $0x2b8] ss:$28 sps:$4 sm:$0xff]   ;;  %v5568_v1 = vld [vmem:[%s7232_s8 + $0xf0] ss:$28 sps:$4 sm:$0xff]  }
 0x3a5   : > { %v6857_v14 = vpack.c.bf16 %v2655_v12, %v2651_v11  ;;  %3846 = vmatpush1.bf16.msra.mxu1 %v5500_v4  ;;  %3932 = vmatpush1.bf16.msra.mxu0 %v5503_v5  ;;  %v5572_v2 = vld [vmem:[%s7232_s8 + $0xf8] ss:$28 sps:$4 sm:$0xff]   ;;  %v5575_v3 = vld [vmem:[%s7232_s8 + $0x12c] ss:$28 sps:$4 sm:$0xff]   ;;  %v5580_v7 = vld [vmem:[%s7232_s8 + $0x164] ss:$28 sps:$4 sm:$0xff]  }
 0x3a6   : > { %3847 = vmatprep.subr.bf16.mxu1 %v5508_v8  ;;  %3933 = vmatprep.subr.bf16.mxu0 %v5511_v10  ;;  %v5576_v4 = vld [vmem:[%s7232_s8 + $0x2f0] ss:$28 sps:$4 sm:$0xff]   ;;  %v5573_v5 = vld [vmem:[%s7232_s8 + $0x128] ss:$28 sps:$4 sm:$0xff]   ;;  %v5578_v10 = vld [vmem:[%s7232_s8 + $0x160] ss:$28 sps:$4 sm:$0xff]  }
 0x3a7   : > { %4877 = vmatprep.mubr.msk.bf16.mxu1 %vm1713_vm0, %v6857_v14  ;;  %4878 = vmatprep.mubr.msk.bf16.mxu0 %vm1713_vm0, %v6857_v14  ;;  %v5577_v6 = vld [vmem:[%s7232_s8 + $0x130] ss:$28 sps:$4 sm:$0xff]   ;;  %v5581_v8 = vld [vmem:[%s7232_s8 + $0x328] ss:$28 sps:$4 sm:$0xff]   ;;  %v5585_v12 = vld [vmem:[%s7232_s8 + $0x19c] ss:$28 sps:$4 sm:$0xff]  }
 0x3a8   : > { %v5582_v11 = vld [vmem:[%s7232_s8 + $0x168] ss:$28 sps:$4 sm:$0xff]  }
 0x3a9   : > { %3848 = vmatpush1.bf16.msra.mxu1 %v5506_v15  ;;  %3934 = vmatpush1.bf16.msra.mxu0 %v5509_v16  ;;  %v5586_v15 = vld [vmem:[%s7232_s8 + $0x360] ss:$28 sps:$4 sm:$0xff]   ;;  %v5583_v16 = vld [vmem:[%s7232_s8 + $0x198] ss:$28 sps:$4 sm:$0xff]  }
 0x3aa   : > { %3849 = vmatprep.subr.bf16.mxu1 %v5514_v17  ;;  %3935 = vmatprep.subr.bf16.mxu0 %v5517_v18  ;;  %v5587_v17 = vld [vmem:[%s7232_s8 + $0x1a0] ss:$28 sps:$4 sm:$0xff]   ;;  %v5590_v18 = vld [vmem:[%s7232_s8 + $0x1d4] ss:$28 sps:$4 sm:$0xff]  }
 0x3ad   : > { %3850 = vmatpush1.bf16.msra.mxu1 %v5512_v19  ;;  %3936 = vmatpush1.bf16.msra.mxu0 %v5515_v20  ;;  %v5588_v19 = vld [vmem:[%s7232_s8 + $0x1d0] ss:$28 sps:$4 sm:$0xff]  }
 0x3ae   : > { %3851 = vmatprep.subr.bf16.mxu1 %v5520_v21  ;;  %3937 = vmatprep.subr.bf16.mxu0 %v5523_v22  ;;  %v5593_v20 = vld [vmem:[%s7232_s8 + $0x20c] ss:$28 sps:$4 sm:$0xff]   ;;  %v5596_v22 = vld [vmem:[%s7232_s8 + $0x244] ss:$28 sps:$4 sm:$0xff]  }
 0x3af   : > { %v5591_v21 = vld [vmem:[%s7232_s8 + $0x208] ss:$28 sps:$4 sm:$0xff]  }
 0x3b1   : > { %3852 = vmatpush1.bf16.msra.mxu1 %v5518_v23  ;;  %3938 = vmatpush1.bf16.msra.mxu0 %v5521_v24  ;;  %v5594_v23 = vld [vmem:[%s7232_s8 + $0x240] ss:$28 sps:$4 sm:$0xff]  }
 0x3b2   : > { %3853 = vmatprep.subr.bf16.mxu1 %v5526_v25  ;;  %3939 = vmatprep.subr.bf16.mxu0 %v5529_v26  ;;  %v5599_v24 = vld [vmem:[%s7232_s8 + $0x27c] ss:$28 sps:$4 sm:$0xff]   ;;  %v5602_v26 = vld [vmem:[%s7232_s8 + $0x2b4] ss:$28 sps:$4 sm:$0xff]  }
 0x3b3   : > { %v5597_v25 = vld [vmem:[%s7232_s8 + $0x278] ss:$28 sps:$4 sm:$0xff]  }
 0x3b5   : > { %3854 = vmatpush1.bf16.msra.mxu1 %v5524_v27  ;;  %3940 = vmatpush1.bf16.msra.mxu0 %v5527_v28  ;;  %v5600_v27 = vld [vmem:[%s7232_s8 + $0x2b0] ss:$28 sps:$4 sm:$0xff]  }
 0x3b6   : > { %3855 = vmatprep.subr.bf16.mxu1 %v5532_v29  ;;  %3941 = vmatprep.subr.bf16.mxu0 %v5535_v30  ;;  %v5605_v28 = vld [vmem:[%s7232_s8 + $0x2ec] ss:$28 sps:$4 sm:$0xff]   ;;  %v5608_v30 = vld [vmem:[%s7232_s8 + $0x324] ss:$28 sps:$4 sm:$0xff]  }
 0x3b7   : > { %v5603_v29 = vld [vmem:[%s7232_s8 + $0x2e8] ss:$28 sps:$4 sm:$0xff]  }
 0x3b9   : > { %3856 = vmatpush1.bf16.msra.mxu1 %v5530_v31  ;;  %3942 = vmatpush1.bf16.msra.mxu0 %v5533_v32  ;;  %v5606_v31 = vld [vmem:[%s7232_s8 + $0x320] ss:$28 sps:$4 sm:$0xff]  }
 0x3ba   : > { %3857 = vmatprep.subr.bf16.mxu1 %v5538_v33  ;;  %3943 = vmatprep.subr.bf16.mxu0 %v5541_v34  ;;  %v5611_v32 = vld [vmem:[%s7232_s8 + $0x35c] ss:$28 sps:$4 sm:$0xff]   ;;  %v5614_v34 = vld [vmem:[%s7232_s8 + $0x394] ss:$28 sps:$4 sm:$0xff]  }
 0x3bb   : > { %v5609_v33 = vld [vmem:[%s7232_s8 + $0x358] ss:$28 sps:$4 sm:$0xff]  }
 0x3bd   : > { %3858 = vmatpush1.bf16.msra.mxu1 %v5536_v35  ;;  %3944 = vmatpush1.bf16.msra.mxu0 %v5539_v36  ;;  %v5612_v35 = vld [vmem:[%s7232_s8 + $0x390] ss:$28 sps:$4 sm:$0xff]  }
 0x3be   : > { %3859 = vmatprep.subr.bf16.mxu1 %v5544_v37  ;;  %3945 = vmatprep.subr.bf16.mxu0 %v5547_v38  ;;  %v5617_v36 = vld [vmem:[%s7232_s8 + $0x3cc] ss:$28 sps:$4 sm:$0xff]   ;;  %v5620_v38 = vld [vmem:[%s7232_s8 + $0x404] ss:$28 sps:$4 sm:$0xff]  }
 0x3bf   : > { %v5615_v37 = vld [vmem:[%s7232_s8 + $0x3c8] ss:$28 sps:$4 sm:$0xff]  }
 0x3c1   : > { %3860 = vmatpush1.bf16.msra.mxu1 %v5542_v39  ;;  %3946 = vmatpush1.bf16.msra.mxu0 %v5545_v40  ;;  %v5618_v39 = vld [vmem:[%s7232_s8 + $0x400] ss:$28 sps:$4 sm:$0xff]   ;;  %v5621_v40 = vld [vmem:[%s7232_s8 + $0x438] ss:$28 sps:$4 sm:$0xff]  }
 0x3c2   : > { %3972 = vmatprep.subr.bf16.mxu1 %v5550_v41  ;;  %4913 = vmatprep.subr.bf16.mxu0 %v5551_v42  ;;  %v5626_v41 = vld [vmem:[%s7232_s8 + $0x474] ss:$28 sps:$4 sm:$0xff]  }
 0x3c3   : > { %v5624_v42 = vld [vmem:[%s7232_s8 + $0x470] ss:$28 sps:$4 sm:$0xff]  }
 0x3c4   : > { %3876 = vmatmul.mubr.bf16.vlgmr.msra.gmra.mrb[12].mxu1 %v6855_v13  ;;  %3962 = vmatmul.mubr.bf16.vlgmr.msra.gmra.mrb[12].mxu0 %v6855_v13 }
 0x3c5   : > { %3973 = vmatpush1.bf16.msra.mxu1 %v5548_v43  ;;  %4004 = vmatprep.mubr.bf16.mxu1 %v6825_v53  ;;  %v5629_v43 = vld [vmem:[%s7232_s8 + $0x4ac] ss:$28 sps:$4 sm:$0xff]  }
 0x3c6   : > { %4914 = vmatpush3.bf16.msra.mxu0 %v5552_v44  ;;  %4090 = vmatprep.mubr.bf16.mxu0 %v6825_v53  ;;  %v5562_v53 = vld [vmem:[%s7232_s8 + $0x88] ss:$28 sps:$4 sm:$0xff]  }
 0x3c7   : > { %3974 = vmatprep.subr.bf16.mxu1 %v5555_v45  ;;  %4915 = vmatprep.subr.bf16.mxu0 %v5556_v46  ;;  %v5627_v44 = vld [vmem:[%s7232_s8 + $0x4a8] ss:$28 sps:$4 sm:$0xff]   ;;  %v5630_v46 = vld [vmem:[%s7232_s8 + $0x4e0] ss:$28 sps:$4 sm:$0xff]  }
 0x3c8   : > { %v5632_v45 = vld [vmem:[%s7232_s8 + $0x4e4] ss:$28 sps:$4 sm:$0xff]  }
 0x3c9   : > { %3975 = vmatpush1.bf16.msra.mxu1 %v5553_v47  ;;  %v5635_v47 = vld [vmem:[%s7232_s8 + $0x51c] ss:$28 sps:$4 sm:$0xff]  }
 0x3ca   : > { %4916 = vmatpush3.bf16.msra.mxu0 %v5557_v48  ;;  %3976 = vmatprep.subr.bf16.mxu1 %v5560_v54  ;;  %v5633_v48 = vld [vmem:[%s7232_s8 + $0x518] ss:$28 sps:$4 sm:$0xff]  }
 0x3cb   : > { %4917 = vmatprep.subr.bf16.mxu0 %v5561_v55  ;;  %v5638_v54 = vld [vmem:[%s7232_s8 + $0x554] ss:$28 sps:$4 sm:$0xff]  }
 0x3cc   : > { %v5636_v55 = vld [vmem:[%s7232_s8 + $0x550] ss:$28 sps:$4 sm:$0xff]  }
 0x3cd   : > { %3977 = vmatpush1.bf16.msra.mxu1 %v5558_v58  ;;  %v5639_v58 = vld [vmem:[%s7232_s8 + $0x398] ss:$28 sps:$4 sm:$0xff]  }
 0x3ce   : > { %4918 = vmatpush3.bf16.msra.mxu0 %v5562_v53  ;;  %3978 = vmatprep.subr.bf16.mxu1 %v5565_v59  ;;  %v5640_v53 = vld [vmem:[%s7232_s8 + $0x3d0] ss:$28 sps:$4 sm:$0xff]   ;;  %v5641_v59 = vld [vmem:[%s7232_s8 + $0x408] ss:$28 sps:$4 sm:$0xff]  }
 0x3cf   : > { %4919 = vmatprep.subr.bf16.mxu0 %v5566_v60  ;;  %v5642_v60 = vld [vmem:[%s7232_s8 + $0x440] ss:$28 sps:$4 sm:$0xff]  }
 0x3d1   : > { %3979 = vmatpush1.bf16.msra.mxu1 %v5563_v61  ;;  %v5644_v61 = vld [vmem:[%s7232_s8 + $0x4b0] ss:$28 sps:$4 sm:$0xff]  }
 0x3d2   : > { %4920 = vmatpush3.bf16.msra.mxu0 %v5567_v62  ;;  %3980 = vmatprep.subr.bf16.mxu1 %v5570_v63  ;;  %v5645_v62 = vld [vmem:[%s7232_s8 + $0x4e8] ss:$28 sps:$4 sm:$0xff]   ;;  %v5646_v63 = vld [vmem:[%s7232_s8 + $0x520] ss:$28 sps:$4 sm:$0xff]  }
 0x3d3   : > { %4921 = vmatprep.subr.bf16.mxu0 %v5571_v0  ;;  %v5647_v0 = vld [vmem:[%s7232_s8 + $0x558] ss:$28 sps:$4 sm:$0xff]  }
 0x3d5   : > { %3981 = vmatpush1.bf16.msra.mxu1 %v5568_v1  ;;  %v7190_v1 = vld [vmem:[%s7233_s9] sm:$0x7f] }
 0x3d6   : > { %4922 = vmatpush3.bf16.msra.mxu0 %v5572_v2  ;;  %3982 = vmatprep.subr.bf16.mxu1 %v5575_v3  ;;  %v2865_v2 = vrot.slane %v7190_v1, %v6504_v51  ;;  %v2873_v3 = vrot.slane %v7190_v1, %v6515_v56 }
 0x3d7   : > { %4923 = vmatprep.subr.bf16.mxu0 %v5576_v4  ;;  %v2869_v4 = vrot.slane %v7190_v1, %v6507_v52 }
 0x3d9   : > { %3983 = vmatpush1.bf16.msra.mxu1 %v5573_v5 }
 0x3da   : > { %4924 = vmatpush3.bf16.msra.mxu0 %v5577_v6  ;;  %3984 = vmatprep.subr.bf16.mxu1 %v5580_v7 }
 0x3db   : > { %4925 = vmatprep.subr.bf16.mxu0 %v5581_v8 }
 0x3dd   : > { %3985 = vmatpush1.bf16.msra.mxu1 %v5578_v10 }
 0x3de   : > { %4926 = vmatpush3.bf16.msra.mxu0 %v5582_v11  ;;  %3986 = vmatprep.subr.bf16.mxu1 %v5585_v12 }
 0x3df   : > { %4927 = vmatprep.subr.bf16.mxu0 %v5586_v15 }
 0x3e1   : > { %3987 = vmatpush1.bf16.msra.mxu1 %v5583_v16 }
 0x3e2   : > { %4928 = vmatpush3.bf16.msra.mxu0 %v5587_v17  ;;  %3988 = vmatprep.subr.bf16.mxu1 %v5590_v18 }
 0x3e5   : > { %4091 = vmatmul.mubr.bf16.vlgmr.msra.gmra.mrb[16].mxu0 %v6823_v50  ;;  %3989 = vmatpush1.bf16.msra.mxu1 %v5588_v19 }
 0x3e6   : > { %3990 = vmatprep.subr.bf16.mxu1 %v5593_v20 }
 0x3e9   : > { %3991 = vmatpush1.bf16.msra.mxu1 %v5591_v21 }
 0x3ea   : > { %3992 = vmatprep.subr.bf16.mxu1 %v5596_v22 }
 0x3ed   : > { %3993 = vmatpush1.bf16.msra.mxu1 %v5594_v23 }
 0x3ee   : > { %3994 = vmatprep.subr.bf16.mxu1 %v5599_v24 }
 0x3f1   : > { %3995 = vmatpush1.bf16.msra.mxu1 %v5597_v25 }
 0x3f2   : > { %3996 = vmatprep.subr.bf16.mxu1 %v5602_v26 }
 0x3f5   : > { %3997 = vmatpush1.bf16.msra.mxu1 %v5600_v27 }
 0x3f6   : > { %3998 = vmatprep.subr.bf16.mxu1 %v5605_v28 }
 0x3f9   : > { %3999 = vmatpush1.bf16.msra.mxu1 %v5603_v29 }
 0x3fa   : > { %4000 = vmatprep.subr.bf16.mxu1 %v5608_v30 }
 0x3fd   : > { %4001 = vmatpush1.bf16.msra.mxu1 %v5606_v31 }
 0x3fe   : > { %4002 = vmatprep.subr.bf16.mxu1 %v5611_v32 }
 0x401   : > { %4003 = vmatpush1.bf16.msra.mxu1 %v5609_v33 }
 0x402   : > { %4015 = vmatprep.subr.bf16.mxu1 %v5614_v34 }
 0x404   : > { %4005 = vmatmul.mubr.bf16.vlgmr.msra.gmra.mrb[16].mxu1 %v6823_v50  ;;  %v5623_v50 = vld [vmem:[%s7232_s8 + $0x43c] ss:$28 sps:$4 sm:$0xff]  }
 0x405   : > { %4016 = vmatpush1.bf16.msra.mxu1 %v5612_v35  ;;  %4879 = vmatprep.mubr.msk.bf16.mxu1 %vm1713_vm0, %v6857_v14 }
 0x406   : > { %4017 = vmatprep.subr.bf16.mxu1 %v5617_v36 }
 0x409   : > { %4018 = vmatpush1.bf16.msra.mxu1 %v5615_v37 }
 0x40a   : > { %4019 = vmatprep.subr.bf16.mxu1 %v5620_v38 }
 0x40d   : > { %4020 = vmatpush1.bf16.msra.mxu1 %v5618_v39 }
 0x40e   : > { %4021 = vmatprep.subr.bf16.mxu1 %v5623_v50 }
 0x411   : > { %4022 = vmatpush1.bf16.msra.mxu1 %v5621_v40 }
 0x412   : > { %4023 = vmatprep.subr.bf16.mxu1 %v5626_v41 }
 0x415   : > { %4024 = vmatpush1.bf16.msra.mxu1 %v5624_v42 }
 0x416   : > { %4025 = vmatprep.subr.bf16.mxu1 %v5629_v43 }
 0x419   : > { %4026 = vmatpush1.bf16.msra.mxu1 %v5627_v44 }
 0x41a   : > { %4027 = vmatprep.subr.bf16.mxu1 %v5632_v45 }
 0x41d   : > { %4028 = vmatpush1.bf16.msra.mxu1 %v5630_v46 }
 0x41e   : > { %4029 = vmatprep.subr.bf16.mxu1 %v5635_v47 }
 0x421   : > { %4030 = vmatpush1.bf16.msra.mxu1 %v5633_v48 }
 0x422   : > { %4031 = vmatprep.subr.bf16.mxu1 %v5638_v54 }
 0x425   : > { %4032 = vmatpush1.bf16.msra.mxu1 %v5636_v55 }
 0x426   : > { %4099 = vmatprep.subr.bf16.mxu1 %v5716_v9 }
 0x428   : > { %4048 = vmatmul.mubr.bf16.vlgmr.msra.gmra.mrb[16].mxu1 %v6855_v13 }
 0x429   : > { %4100 = vmatpush1.bf16.msra.mxu1 %v5639_v58  ;;  %4880 = vmatprep.mubr.msk.bf16.mxu1 %vm1713_vm0, %v6857_v14  ;;  %v5643_v14 = vld [vmem:[%s7232_s8 + $0x478] ss:$28 sps:$4 sm:$0xff]  }
 0x42a   : > { %4101 = vmatprep.subr.bf16.mxu1 %v5716_v9 }
 0x42d   : > { %4102 = vmatpush1.bf16.msra.mxu1 %v5640_v53 }
 0x42e   : > { %4103 = vmatprep.subr.bf16.mxu1 %v5716_v9 }
 0x431   : > { %4104 = vmatpush1.bf16.msra.mxu1 %v5641_v59 }
 0x432   : > { %4105 = vmatprep.subr.bf16.mxu1 %v5716_v9 }
 0x435   : > { %4106 = vmatpush1.bf16.msra.mxu1 %v5642_v60 }
 0x436   : > { %4107 = vmatprep.subr.bf16.mxu1 %v5716_v9 }
 0x439   : > { %4108 = vmatpush1.bf16.msra.mxu1 %v5643_v14 }
 0x43a   : > { %4109 = vmatprep.subr.bf16.mxu1 %v5716_v9 }
 0x43d   : > { %4110 = vmatpush1.bf16.msra.mxu1 %v5644_v61 }
 0x43e   : > { %4111 = vmatprep.subr.bf16.mxu1 %v5716_v9 }
 0x441   : > { %4112 = vmatpush1.bf16.msra.mxu1 %v5645_v62 }
 0x442   : > { %4113 = vmatprep.subr.bf16.mxu1 %v5716_v9 }
 0x445   : > { %4114 = vmatpush1.bf16.msra.mxu1 %v5646_v63 }
 0x446   : > { %4115 = vmatprep.subr.bf16.mxu1 %v5716_v9  ;;  %v2877_v9 = vrot.slane %v7190_v1, %v6518_v57 }
 0x449   : > { %4116 = vmatpush1.bf16.msra.mxu1 %v5647_v0 }
 0x44c   : > { %4132 = vmatmul.mubr.bf16.vlgmr.msra.gmra.mrb[20].mxu1 %v6855_v13 }
 0x497   : > { %v3877_v5 = vpop.f32.mrb[12].mxu1  ;;  %v3963_v6 = vpop.f32.mrb[12].mxu0 }
 0x498   : > { %v4951_v13 = vadd.f32 %v3877_v5, %v2865_v2  ;;  %v4955_v7 = vadd.f32 %v3963_v6, %v2873_v3  ;;  %v3879_v8 = vpop.f32.mrb[13].mxu1  ;;  %v3965_v10 = vpop.f32.mrb[13].mxu0 }
 0x499   : > { %v4952_v11 = vadd.f32 %v3879_v8, %v2869_v4  ;;  %v4956_v12 = vadd.f32 %v3965_v10, %v2877_v9  ;;  %v3881_v15 = vpop.f32.mrb[14].mxu1  ;;  %v3967_v16 = vpop.f32.mrb[14].mxu0 }
 0x49a   : > { %v4881_v51 = vmul.f32 -1.442695, %v4951_v13  ;;  %v4883_v17 = vmul.f32 -1.442695, %v4955_v7  ;;  %v4953_v18 = vadd.f32 %v3881_v15, %v2865_v2  ;;  %v4957_v56 = vadd.f32 %v3967_v16, %v2873_v3  ;;  %v3883_v19 = vpop.f32.mrb[15].mxu1  ;;  %v3969_v20 = vpop.f32.mrb[15].mxu0 }
 0x49b   : > { %v4882_v52 = vmul.f32 -1.442695, %v4952_v11  ;;  %v4884_v21 = vmul.f32 -1.442695, %v4956_v12  ;;  %v4954_v22 = vadd.f32 %v3883_v19, %v2869_v4  ;;  %v4958_v57 = vadd.f32 %v3969_v20, %v2877_v9 }
 0x49c   : > { %5652 = vpow2.f32 %v4881_v51  ;;  %v4888_v23 = vmul.f32 -1.442695, %v4953_v18  ;;  %v4890_v24 = vmul.f32 -1.442695, %v4957_v56  ;;  %v2880_v2 = vsub.s32 4, %v6501_v49 }
 0x49d   : > { %5654 = vpow2.f32 %v4883_v17  ;;  %v4889_v25 = vmul.f32 -1.442695, %v4954_v22  ;;  %v4891_v26 = vmul.f32 -1.442695, %v4958_v57  ;;  %v2884_v3 = vsub.s32 5, %v6501_v49 }
 0x49e   : > { %5656 = vpow2.f32 %v4882_v52  ;;  %v2881_v4 = vrot.slane %v7190_v1, %v2880_v2 }
 0x49f   : > { %5658 = vpow2.f32 %v4884_v21  ;;  %v2885_v9 = vrot.slane %v7190_v1, %v2884_v3 }
 0x4a0   : > { %5660 = vpow2.f32 %v4888_v23  ;;  %v2888_v23 = vsub.s32 6, %v6501_v49 }
 0x4a1   : > { %5662 = vpow2.f32 %v4890_v24 }
 0x4a2   : > { %5664 = vpow2.f32 %v4889_v25 }
 0x4a3   : > { %5666 = vpow2.f32 %v4891_v26 }
 0x4a6   : > { %v5653_v27 = vpop.eup %5652 }
 0x4a7   : > { %v5655_v28 = vpop.eup %5654  ;;  %v4182_v29 = vadd.f32 1.0, %v5653_v27 }
 0x4a8   : > { %v5657_v30 = vpop.eup %5656  ;;  %v4184_v31 = vadd.f32 1.0, %v5655_v28 }
 0x4a9   : > { %v5659_v32 = vpop.eup %5658  ;;  %5668 = vrcp.f32 %v4182_v29  ;;  %v4183_v33 = vadd.f32 1.0, %v5657_v30  ;;  %v2889_v29 = vrot.slane %v7190_v1, %v2888_v23 }
 0x4aa   : > { %v5661_v34 = vpop.eup %5660  ;;  %5670 = vrcp.f32 %v4184_v31  ;;  %v4185_v35 = vadd.f32 1.0, %v5659_v32 }
 0x4ab   : > { %v5663_v36 = vpop.eup %5662  ;;  %5672 = vrcp.f32 %v4183_v33  ;;  %v4189_v37 = vadd.f32 1.0, %v5661_v34 }
 0x4ac   : > { %v5665_v38 = vpop.eup %5664  ;;  %5674 = vrcp.f32 %v4185_v35  ;;  %v4191_v39 = vadd.f32 1.0, %v5663_v36 }
 0x4ad   : > { %v5667_v50 = vpop.eup %5666  ;;  %5676 = vrcp.f32 %v4189_v37  ;;  %v4190_v40 = vadd.f32 1.0, %v5665_v38 }
 0x4ae   : > { %5678 = vrcp.f32 %v4191_v39  ;;  %v4192_v41 = vadd.f32 1.0, %v5667_v50 }
 0x4af   : > { %5680 = vrcp.f32 %v4190_v40 }
 0x4b0   : > { %5682 = vrcp.f32 %v4192_v41 }
 0x4b3   : > { %v5669_v42 = vpop.eup %5668 }
 0x4b4   : > { %v5671_v43 = vpop.eup %5670 }
 0x4b5   : > { %v5673_v44 = vpop.eup %5672 }
 0x4b6   : > { %v5675_v45 = vpop.eup %5674  ;;  %v4905_v46 = vpack.c.bf16 %v5673_v44, %v5669_v42 }
 0x4b7   : > { %v5677_v47 = vpop.eup %5676  ;;  %v4906_v48 = vpack.c.bf16 %v5675_v45, %v5671_v43 }
 0x4b8   : > { %v5679_v54 = vpop.eup %5678  ;;  %4268 = vst [vmem:[%s7205_s14] sm:$0xff] %v4905_v46  ;;  %v4929_v55 = vpop.f32.mrb[16].mxu0 }
 0x4b9   : > { %v5681_v58 = vpop.eup %5680  ;;  %4269 = vst [vmem:[%s7205_s14 + $0x8] sm:$0xff] %v4906_v48  ;;  %v4930_v53 = vpop.f32.mrb[17].mxu0 }
 0x4ba   : > { %v5683_v59 = vpop.eup %5682  ;;  %v4909_v60 = vpack.c.bf16 %v5681_v58, %v5677_v47  ;;  %v4931_v14 = vadd.f32 %v4930_v53, %v4929_v55  ;;  %v4932_v61 = vpop.f32.mrb[18].mxu0 }
 0x4bb   : > { %v4910_v62 = vpack.c.bf16 %v5683_v59, %v5679_v54  ;;  %v4933_v63 = vpop.f32.mrb[19].mxu0 }
 0x4bc   : > { %4273 = vst [vmem:[%s7205_s14 + $0x1c] sm:$0xff] %v4909_v60  ;;  %v4934_v0 = vadd.f32 %v4933_v63, %v4932_v61  ;;  %v4093_v31 = vadd.f32 %v4931_v14, %v2889_v29 }
 0x4bd   : > { %4274 = vst [vmem:[%s7205_s14 + $0x24] sm:$0xff] %v4910_v62 }
 0x4be   : > { %v4096_v35 = vadd.f32 %v4934_v0, %v2889_v29 }
 0x4fb   : > { %v4049_v5 = vpop.f32.mrb[16].mxu1 }
 0x4fc   : > { %v4959_v6 = vadd.f32 %v4049_v5, %v2881_v4  ;;  %v4051_v13 = vpop.f32.mrb[17].mxu1 }
 0x4fd   : > { %v4960_v7 = vadd.f32 %v4051_v13, %v2885_v9  ;;  %v4053_v8 = vpop.f32.mrb[18].mxu1 }
 0x4fe   : > { %v4885_v10 = vmul.f32 -1.442695, %v4959_v6  ;;  %v4961_v11 = vadd.f32 %v4053_v8, %v2881_v4  ;;  %v4055_v12 = vpop.f32.mrb[19].mxu1 }
 0x4ff   : > { %v4886_v15 = vmul.f32 -1.442695, %v4960_v7  ;;  %v4962_v16 = vadd.f32 %v4055_v12, %v2885_v9 }
 0x500   : > { %5684 = vpow2.f32 %v4885_v10  ;;  %v4892_v51 = vmul.f32 -1.442695, %v4961_v11 }
 0x501   : > { %5686 = vpow2.f32 %v4886_v15  ;;  %v4893_v17 = vmul.f32 -1.442695, %v4962_v16 }
 0x502   : > { %5688 = vpow2.f32 %v4892_v51 }
 0x503   : > { %5690 = vpow2.f32 %v4893_v17 }
 0x50a   : > { %v5685_v18 = vpop.eup %5684 }
 0x50b   : > { %v5687_v56 = vpop.eup %5686  ;;  %v4186_v19 = vadd.f32 1.0, %v5685_v18 }
 0x50c   : > { %v5689_v20 = vpop.eup %5688  ;;  %v4187_v52 = vadd.f32 1.0, %v5687_v56 }
 0x50d   : > { %v5691_v21 = vpop.eup %5690  ;;  %5692 = vrcp.f32 %v4186_v19  ;;  %v4193_v22 = vadd.f32 1.0, %v5689_v20 }
 0x50e   : > { %5694 = vrcp.f32 %v4187_v52  ;;  %v4194_v57 = vadd.f32 1.0, %v5691_v21 }
 0x50f   : > { %5696 = vrcp.f32 %v4193_v22 }
 0x510   : > { %5698 = vrcp.f32 %v4194_v57 }
 0x517   : > { %v5693_v24 = vpop.eup %5692 }
 0x518   : > { %v5695_v25 = vpop.eup %5694 }
 0x519   : > { %v5697_v26 = vpop.eup %5696  ;;  %v4907_v27 = vpack.c.bf16 %v5695_v25, %v5693_v24 }
 0x51a   : > { %v5699_v28 = vpop.eup %5698 }
 0x51b   : > { %4270 = vst [vmem:[%s7205_s14 + $0x10] sm:$0xff] %v4907_v27  ;;  %v4911_v30 = vpack.c.bf16 %v5699_v28, %v5697_v26 }
 0x51d   : > { %4275 = vst [vmem:[%s7205_s14 + $0x2c] sm:$0xff] %v4911_v30 }
 0x51f   : > { %v4133_v32 = vpop.f32.mrb[20].mxu1 }
 0x520   : > { %v4134_v33 = vadd.f32 %v4133_v32, %v4093_v31  ;;  %v4135_v34 = vpop.f32.mrb[21].mxu1 }
 0x521   : > { %v4136_v36 = vpop.f32.mrb[22].mxu1 }
 0x522   : > { %v4887_v37 = vmul.f32 -1.442695, %v4134_v33  ;;  %v4137_v38 = vadd.f32 %v4136_v36, %v4096_v35  ;;  %v4138_v49 = vpop.f32.mrb[23].mxu1 }
 0x524   : > { %5700 = vpow2.f32 %v4887_v37  ;;  %v4894_v39 = vmul.f32 -1.442695, %v4137_v38 }
 0x526   : > { %5702 = vpow2.f32 %v4894_v39 }
 0x52e   : > { %v5701_v50 = vpop.eup %5700 }
 0x52f   : > { %v4188_v40 = vadd.f32 1.0, %v5701_v50 }
 0x530   : > { %v5703_v1 = vpop.eup %5702 }
 0x531   : > { %5704 = vrcp.f32 %v4188_v40  ;;  %v4195_v41 = vadd.f32 1.0, %v5703_v1 }
 0x533   : > { %5706 = vrcp.f32 %v4195_v41 }
 0x53b   : > { %v5705_v42 = vpop.eup %5704 }
 0x53c   : > { %v4908_v43 = vpack.c.bf16 %v5705_v42, %v5705_v42 }
 0x53d   : > { %v5707_v44 = vpop.eup %5706 }
 0x53e   : > { %4272 = vst.msk [vmem:[%s7205_s14 + $0x18] sm:$0xf] %vm4271_vm3, %v4908_v43  ;;  %v4912_v45 = vpack.c.bf16 %v5707_v44, %v5707_v44 }
 0x540   : > { %4276 = vst.msk [vmem:[%s7205_s14 + $0x34] sm:$0xf] %vm4271_vm3, %v4912_v45 }
 0x541 PF: > { %s23_s21 = sadd.s32 1, %s5714_s21  }
 0x542   : > { %p20_p4 = scmp.ge.s32.totalorder %s23_s21, 5  }
 0x544   :  { %22 = sbr.rel (!%p20_p4) target bundleno = 1 (0x1), region = 117 }

</bundles_post_ra>
